<compile_context>
chip_gen: v6e
topology: v6e:2x2x1
jax: 0.10.0
libtpu: 0.0.40
codegen_flags: <defaults>
</compile_context>

<pallas_src>
import jax
import jax.numpy as jnp
from jax import lax
from jax.experimental import pallas as pl
from jax.experimental.pallas import tpu as pltpu


# ---------------------------------------------------------------------------
# One-time parameter preparation (hoisted OUT of the per-step decode path).
# ---------------------------------------------------------------------------
def prepare_decoder_rnn_params(w_ih, w_hh, b_ih, b_hh):
    """Transpose / cast / fuse once; reuse across all decode steps."""
    wih_t = jnp.transpose(w_ih).astype(jnp.bfloat16)            # (D, 4H)
    whh_t = jnp.transpose(w_hh).astype(jnp.bfloat16)            # (H, 4H)
    bias = (b_ih + b_hh).reshape(1, -1).astype(jnp.float32)     # (1, 4H)
    return wih_t, whh_t, bias


# ---------------------------------------------------------------------------
# Single-step kernel (this is exactly DecoderRNN.forward: one zoneout-LSTM step)
# ---------------------------------------------------------------------------
def _make_step_kernel(hidden, zoneout_rate):
    H = int(hidden)
    z = float(zoneout_rate)   # Python float -> compile-time literal

    def kernel(x_ref, h_ref, c_ref, wih_ref, whh_ref, b_ref,
               h_out_ref, c_out_ref):
        x = x_ref[...]                                   # (B, D)  f32
        h = h_ref[...]                                   # (B, H)  f32
        c = c_ref[...]                                   # (B, H)  f32

        # Two MXU matmuls accumulated in f32 (no concat copy on the critical
        # path; matches the reference accumulation order exactly).
        gates = (jnp.dot(x.astype(jnp.bfloat16), wih_ref[...],
                         preferred_element_type=jnp.float32)
                 + jnp.dot(h.astype(jnp.bfloat16), whh_ref[...],
                           preferred_element_type=jnp.float32)
                 + b_ref[...])                            # (B, 4H) f32

        # Gate slabs are 128-lane aligned (H % 128 == 0) -> full-width VPU/EUP.
        i_g = jax.nn.sigmoid(gates[:, 0 * H:1 * H])
        f_g = jax.nn.sigmoid(gates[:, 1 * H:2 * H])
        g_g = jnp.tanh(gates[:, 2 * H:3 * H])
        o_g = jax.nn.sigmoid(gates[:, 3 * H:4 * H])

        c_new = f_g * c + i_g * g_g
        h_new = o_g * jnp.tanh(c_new)

        # Deterministic (eval-mode) zoneout.
        h_out_ref[...] = z * h + (1.0 - z) * h_new
        c_out_ref[...] = z * c + (1.0 - z) * c_new

    return kernel


def decoder_rnn_forward(x, h, c, prepared_params, *, zoneout_rate=0.1,
                        donate_state=True):
    """One ZoneOut-LSTMCell step (the module's forward).

    x: (B, D); h, c: (B, H); prepared_params from prepare_decoder_rnn_params().
    Returns (h_out, c_out), both (B, H) float32.

    NOTE: with donate_state=True the h/c input buffers are aliased to the
    outputs (donated) — do not read the caller's h/c after this call.
    """
    wih_t, whh_t, bias = prepared_params
    B, D = x.shape
    H = h.shape[-1]

    kernel = _make_step_kernel(H, zoneout_rate)

    grid_spec = pltpu.PrefetchScalarGridSpec(
        num_scalar_prefetch=0,
        grid=(1,),
        in_specs=[
            pl.BlockSpec((B, D), lambda i: (0, 0)),
            pl.BlockSpec((B, H), lambda i: (0, 0)),
            pl.BlockSpec((B, H), lambda i: (0, 0)),
            pl.BlockSpec((D, 4 * H), lambda i: (0, 0)),
            pl.BlockSpec((H, 4 * H), lambda i: (0, 0)),
            pl.BlockSpec((1, 4 * H), lambda i: (0, 0)),
        ],
        out_specs=(pl.BlockSpec((B, H), lambda i: (0, 0)),
                   pl.BlockSpec((B, H), lambda i: (0, 0))),
    )

    aliases = {1: 0, 2: 1} if donate_state else {}

    h_out, c_out = pl.pallas_call(
        kernel,
        out_shape=(jax.ShapeDtypeStruct((B, H), jnp.float32),
                   jax.ShapeDtypeStruct((B, H), jnp.float32)),
        grid_spec=grid_spec,
        input_output_aliases=aliases,
        compiler_params=pltpu.CompilerParams(
            dimension_semantics=("arbitrary",)),
    )(x.astype(jnp.float32), h.astype(jnp.float32), c.astype(jnp.float32),
      wih_t, whh_t, bias)
    return h_out, c_out


# ---------------------------------------------------------------------------
# Sequence variant: recurrence hoisted into the kernel, time axis CHUNKED.
# grid=(B//BB, T//C); each grid step runs C timesteps in an unrolled fori_loop.
# W_hh^T is VMEM-resident (constant index_map), h/c carried in VMEM scratch,
# whole-sequence input projection precomputed as one large GEMM outside.
# ---------------------------------------------------------------------------
def _make_sequence_kernel(hidden, chunk, zoneout_rate):
    H = int(hidden)
    C = int(chunk)
    z = float(zoneout_rate)

    def kernel(xproj_ref, whh_ref, h0_ref, c0_ref,
               hseq_ref, h_last_ref, c_last_ref, h_sc, c_sc):
        ti = pl.program_id(1)

        @pl.when(ti == 0)
        def _():
            h_sc[...] = h0_ref[...]
            c_sc[...] = c0_ref[...]

        def step(s, carry):
            h, c = carry                                 # (BB, H) f32 each
            # Only the recurrent projection is inside the loop; the input
            # projection (plus both biases) was precomputed outside.
            gates = xproj_ref[s] + jnp.dot(
                h.astype(jnp.bfloat16), whh_ref[...],
                preferred_element_type=jnp.float32)      # (BB, 4H) f32

            i_g = jax.nn.sigmoid(gates[:, 0 * H:1 * H])
            f_g = jax.nn.sigmoid(gates[:, 1 * H:2 * H])
            g_g = jnp.tanh(gates[:, 2 * H:3 * H])
            o_g = jax.nn.sigmoid(gates[:, 3 * H:4 * H])

            c_new = f_g * c + i_g * g_g
            h_new = o_g * jnp.tanh(c_new)

            h_z = z * h + (1.0 - z) * h_new
            c_z = z * c + (1.0 - z) * c_new

            hseq_ref[s] = h_z                            # per-step hidden out
            return h_z, c_z

        # Unrolled so the LLO scheduler can overlap step t's EUP tail with
        # step t+1's MXU push (separate VLIW slots).
        h_fin, c_fin = lax.fori_loop(
            0, C, step, (h_sc[...], c_sc[...]), unroll=True)

        h_sc[...] = h_fin
        c_sc[...] = c_fin

        # Final-state writes only on the last time chunk (saves vst slots).
        @pl.when(ti == pl.num_programs(1) - 1)
        def _():
            h_last_ref[...] = h_fin
            c_last_ref[...] = c_fin

    return kernel


def decoder_rnn_sequence_forward(x_seq, h0, c0, w_ih, w_hh, b_ih, b_hh, *,
                                 zoneout_rate=0.1, time_chunk=8,
                                 batch_block=None):
    """Apply the zoneout-LSTM cell over a whole sequence inside one kernel.

    x_seq: (T, B, D); h0, c0: (B, H). Returns (h_seq (T,B,H), h_last, c_last).
    time_chunk: timesteps per grid step (amortizes grid-step overhead).
    batch_block: batch-block size for the leading "parallel" grid axis
      (lets v7x shard independent streams across its 2 TensorCores).
    """
    T, B, D = x_seq.shape
    H = h0.shape[-1]

    # Pick the largest chunk <= time_chunk that divides T.
    C = max(1, min(int(time_chunk), T))
    while T % C:
        C -= 1
    BB = B if batch_block is None else int(batch_block)
    assert B % BB == 0, "batch_block must divide batch"

    bias = (b_ih + b_hh).astype(jnp.float32)
    # Whole-sequence input projection as one large, MXU-friendly GEMM (bf16 in,
    # f32 accumulate), done outside the kernel.
    xproj = jnp.einsum(
        "tbd,gd->tbg", x_seq.astype(jnp.bfloat16), w_ih.astype(jnp.bfloat16),
        preferred_element_type=jnp.float32) + bias                  # (T, B, 4H)

    whh_t = jnp.transpose(w_hh).astype(jnp.bfloat16)                # (H, 4H)

    kernel = _make_sequence_kernel(H, C, zoneout_rate)

    grid_spec = pltpu.PrefetchScalarGridSpec(
        num_scalar_prefetch=0,
        grid=(B // BB, T // C),
        in_specs=[
            pl.BlockSpec((C, BB, 4 * H), lambda bi, ti: (ti, bi, 0)),  # xproj chunk
            pl.BlockSpec((H, 4 * H), lambda bi, ti: (0, 0)),           # W_hh^T resident
            pl.BlockSpec((BB, H), lambda bi, ti: (bi, 0)),             # h0
            pl.BlockSpec((BB, H), lambda bi, ti: (bi, 0)),             # c0
        ],
        out_specs=(
            pl.BlockSpec((C, BB, H), lambda bi, ti: (ti, bi, 0)),      # hidden chunk
            pl.BlockSpec((BB, H), lambda bi, ti: (bi, 0)),             # final h
            pl.BlockSpec((BB, H), lambda bi, ti: (bi, 0)),             # final c
        ),
        scratch_shapes=[pltpu.VMEM((BB, H), jnp.float32),              # carried h
                        pltpu.VMEM((BB, H), jnp.float32)],             # carried c
    )

    h_seq, h_last, c_last = pl.pallas_call(
        kernel,
        out_shape=(jax.ShapeDtypeStruct((T, B, H), jnp.float32),
                   jax.ShapeDtypeStruct((B, H), jnp.float32),
                   jax.ShapeDtypeStruct((B, H), jnp.float32)),
        grid_spec=grid_spec,
        compiler_params=pltpu.CompilerParams(
            dimension_semantics=("parallel", "arbitrary")),  # batch || , time sequential
    )(xproj, whh_t, h0.astype(jnp.float32), c0.astype(jnp.float32))
    return h_seq, h_last, c_last


# ---------------------------------------------------------------------------
# Pure-JAX references
# ---------------------------------------------------------------------------
def _reference_step(x, h, c, w_ih, w_hh, b_ih, b_hh, zoneout_rate, matmul_dtype):
    gates = (jnp.dot(x.astype(matmul_dtype), w_ih.T.astype(matmul_dtype),
                     preferred_element_type=jnp.float32)
             + jnp.dot(h.astype(matmul_dtype), w_hh.T.astype(matmul_dtype),
                       preferred_element_type=jnp.float32)
             + (b_ih + b_hh))
    H = h.shape[-1]
    i = jax.nn.sigmoid(gates[:, 0 * H:1 * H])
    f = jax.nn.sigmoid(gates[:, 1 * H:2 * H])
    g = jnp.tanh(gates[:, 2 * H:3 * H])
    o = jax.nn.sigmoid(gates[:, 3 * H:4 * H])
    c_new = f * c + i * g
    h_new = o * jnp.tanh(c_new)
    z = zoneout_rate
    return z * h + (1 - z) * h_new, z * c + (1 - z) * c_new


def _reference_sequence(x_seq, h, c, w_ih, w_hh, b_ih, b_hh, zoneout_rate,
                        matmul_dtype):
    hs = []
    for t in range(x_seq.shape[0]):
        h, c = _reference_step(x_seq[t], h, c, w_ih, w_hh, b_ih, b_hh,
                               zoneout_rate, matmul_dtype)
        hs.append(h)
    return jnp.stack(hs, axis=0), h, c


if __name__ == "__main__":
    # Small but lane/sublane-aligned shapes (H multiple of 128, B = 8 sublanes).
    B, D, H, T = 8, 128, 128, 32
    zoneout_rate = 0.1

    key = jax.random.PRNGKey(0)
    kxs, kh, kc, k1, k2, k3, k4 = jax.random.split(key, 7)

    x_seq = jax.random.normal(kxs, (T, B, D), dtype=jnp.float32)
    x_step = x_seq[0]
    h0 = jax.random.normal(kh, (B, H), dtype=jnp.float32)
    c0 = jax.random.normal(kc, (B, H), dtype=jnp.float32)

    # PyTorch LSTMCell default init: U(-1/sqrt(H), 1/sqrt(H)).
    bound = float(1.0 / (H ** 0.5))
    w_ih = jax.random.uniform(k1, (4 * H, D), minval=-bound, maxval=bound,
                              dtype=jnp.float32)
    w_hh = jax.random.uniform(k2, (4 * H, H), minval=-bound, maxval=bound,
                              dtype=jnp.float32)
    b_ih = jax.random.uniform(k3, (4 * H,), minval=-bound, maxval=bound,
                              dtype=jnp.float32)
    b_hh = jax.random.uniform(k4, (4 * H,), minval=-bound, maxval=bound,
                              dtype=jnp.float32)

    # References first: the single-step pallas_call donates h0/c0 via aliasing.
    h_ref_bf16, c_ref_bf16 = _reference_step(
        x_step, h0, c0, w_ih, w_hh, b_ih, b_hh, zoneout_rate, jnp.bfloat16)
    h_ref_f32, c_ref_f32 = _reference_step(
        x_step, h0, c0, w_ih, w_hh, b_ih, b_hh, zoneout_rate, jnp.float32)
    hseq_ref, hlast_ref, clast_ref = _reference_sequence(
        x_seq, h0, c0, w_ih, w_hh, b_ih, b_hh, zoneout_rate, jnp.bfloat16)

    # Sequence kernel (recurrence inside the kernel, time axis chunked).
    h_seq, h_last, c_last = decoder_rnn_sequence_forward(
        x_seq, h0, c0, w_ih, w_hh, b_ih, b_hh,
        zoneout_rate=zoneout_rate, time_chunk=8)
    jax.block_until_ready((h_seq, h_last, c_last))

    # Single-step kernel = the module's forward. Weights prepared ONCE, then
    # reused across decode steps. Called last: donates the h0/c0 buffers.
    params = prepare_decoder_rnn_params(w_ih, w_hh, b_ih, b_hh)
    jax.block_until_ready(params)
    h_out, c_out = decoder_rnn_forward(
        x_step, h0, c0, params, zoneout_rate=zoneout_rate)
    jax.block_until_ready((h_out, c_out))

    # Tight check against the matched-precision (bf16-MXU, f32-accumulate) reference.
    assert jnp.allclose(h_out, h_ref_bf16, atol=2e-3, rtol=2e-3)
    assert jnp.allclose(c_out, c_ref_bf16, atol=2e-3, rtol=2e-3)
    # Loose check against the pure-f32 PyTorch math (diff is bf16 matmul rounding only).
    assert jnp.allclose(h_out, h_ref_f32, atol=5e-2, rtol=5e-2)
    assert jnp.allclose(c_out, c_ref_f32, atol=5e-2, rtol=5e-2)

    # Sequence variant vs a per-step reference loop with the same precision.
    assert jnp.allclose(h_seq, hseq_ref, atol=1e-2, rtol=1e-2)
    assert jnp.allclose(h_last, hlast_ref, atol=1e-2, rtol=1e-2)
    assert jnp.allclose(c_last, clast_ref, atol=1e-2, rtol=1e-2)

    print("KERNEL_OK")
</pallas_src>

<mosaic_0001>
module attributes {stable_mosaic.version = 11 : i64} {
  func.func @kernel(%arg0: i32, %arg1: i32, %arg2: memref<8x8x512xf32, #tpu.memory_space<vmem>>, %arg3: memref<128x512xbf16, #tpu.memory_space<vmem>>, %arg4: memref<8x128xf32, #tpu.memory_space<vmem>>, %arg5: memref<8x128xf32, #tpu.memory_space<vmem>>, %arg6: memref<8x8x128xf32, #tpu.memory_space<vmem>>, %arg7: memref<8x128xf32, #tpu.memory_space<vmem>>, %arg8: memref<8x128xf32, #tpu.memory_space<vmem>>, %arg9: memref<8x128xf32, #tpu.memory_space<vmem>>, %arg10: memref<8x128xf32, #tpu.memory_space<vmem>>) attributes {dimension_semantics = [#tpu.dimension_semantics<parallel>, #tpu.dimension_semantics<arbitrary>], iteration_bounds = array<i64: 1, 4>, scalar_prefetch = 0 : i64, scratch_operands = 2 : i64, tpu.core_type = #tpu.core_type<tc>, window_params = [{transform_indices = @transform_0, window_bounds = array<i64: 8, 8, 512>}, {pipeline_mode = #tpu.pipeline_mode<synchronous>, transform_indices = @transform_1, window_bounds = array<i64: 128, 512>}, {transform_indices = @transform_2, window_bounds = array<i64: 8, 128>}, {transform_indices = @transform_3, window_bounds = array<i64: 8, 128>}, {transform_indices = @transform_4, window_bounds = array<i64: 8, 8, 128>}, {transform_indices = @transform_5, window_bounds = array<i64: 8, 128>}, {transform_indices = @transform_6, window_bounds = array<i64: 8, 128>}]} {
    %c0_i32 = arith.constant 0 : i32
    %0 = arith.cmpi eq, %arg1, %c0_i32 : i32
    %1 = arith.extui %0 : i1 to i32
    %c0_i32_0 = arith.constant 0 : i32
    %2 = arith.cmpi ne, %1, %c0_i32_0 : i32
    scf.if %2 {
      %c0_122 = arith.constant 0 : index
      %c0_123 = arith.constant 0 : index
      %378 = vector.load %arg4[%c0_122, %c0_123] : memref<8x128xf32, #tpu.memory_space<vmem>>, vector<8x128xf32>
      %c0_124 = arith.constant 0 : index
      %c0_125 = arith.constant 0 : index
      %379 = vector.load %arg9[%c0_124, %c0_125] : memref<8x128xf32, #tpu.memory_space<vmem>>, vector<8x128xf32>
      tpu.vector_store %arg9[%c0_124, %c0_125], %378 {strides = array<i32>} : memref<8x128xf32, #tpu.memory_space<vmem>>, vector<8x128xf32>,
      %c0_126 = arith.constant 0 : index
      %c0_127 = arith.constant 0 : index
      %380 = vector.load %arg5[%c0_126, %c0_127] : memref<8x128xf32, #tpu.memory_space<vmem>>, vector<8x128xf32>
      %c0_128 = arith.constant 0 : index
      %c0_129 = arith.constant 0 : index
      %381 = vector.load %arg10[%c0_128, %c0_129] : memref<8x128xf32, #tpu.memory_space<vmem>>, vector<8x128xf32>
      tpu.vector_store %arg10[%c0_128, %c0_129], %380 {strides = array<i32>} : memref<8x128xf32, #tpu.memory_space<vmem>>, vector<8x128xf32>,
    } else {
    }
    %c0 = arith.constant 0 : index
    %c0_1 = arith.constant 0 : index
    %3 = vector.load %arg9[%c0, %c0_1] : memref<8x128xf32, #tpu.memory_space<vmem>>, vector<8x128xf32>
    %c0_2 = arith.constant 0 : index
    %c0_3 = arith.constant 0 : index
    %4 = vector.load %arg10[%c0_2, %c0_3] : memref<8x128xf32, #tpu.memory_space<vmem>>, vector<8x128xf32>
    %c0_i32_4 = arith.constant 0 : i32
    %5 = arith.index_cast %c0_i32_4 : i32 to index
    %c0_5 = arith.constant 0 : index
    %c0_6 = arith.constant 0 : index
    %6 = vector.load %arg2[%5, %c0_5, %c0_6] : memref<8x8x512xf32, #tpu.memory_space<vmem>>, vector<1x8x512xf32>
    %7 = vector.shape_cast %6 : vector<1x8x512xf32> to vector<8x512xf32>
    %8 = arith.truncf %3 : vector<8x128xf32> to vector<8x128xbf16>
    %c0_7 = arith.constant 0 : index
    %c0_8 = arith.constant 0 : index
    %9 = vector.load %arg3[%c0_7, %c0_8] : memref<128x512xbf16, #tpu.memory_space<vmem>>, vector<128x512xbf16>
    %cst = arith.constant dense<0.000000e+00> : vector<8x512xf32>
    %10 = tpu.matmul %8, %9, %cst {dimension_numbers = #tpu.dot_dimension_numbers<[1], [0], [0], [1], [0, 0, 1, 1], [], []>} : vector<8x128xbf16>, vector<128x512xbf16>, vector<8x512xf32> -> vector<8x512xf32>
    %11 = arith.addf %7, %10 : vector<8x512xf32>
    %12 = vector.extract_strided_slice %11 {offsets = [0, 0], sizes = [8, 128], strides = [1, 1]} : vector<8x512xf32> to vector<8x128xf32>
    %13 = arith.negf %12 : vector<8x128xf32>
    %14 = math.exp %13 : vector<8x128xf32>
    %cst_9 = arith.constant 1.000000e+00 : f32
    %15 = vector.broadcast %cst_9 : f32 to vector<8x128xf32>
    %16 = arith.addf %15, %14 : vector<8x128xf32>
    %17 = arith.divf %15, %16 : vector<8x128xf32>
    %18 = vector.extract_strided_slice %11 {offsets = [0, 128], sizes = [8, 128], strides = [1, 1]} : vector<8x512xf32> to vector<8x128xf32>
    %19 = arith.negf %18 : vector<8x128xf32>
    %20 = math.exp %19 : vector<8x128xf32>
    %cst_10 = arith.constant 1.000000e+00 : f32
    %21 = vector.broadcast %cst_10 : f32 to vector<8x128xf32>
    %22 = arith.addf %21, %20 : vector<8x128xf32>
    %23 = arith.divf %21, %22 : vector<8x128xf32>
    %24 = vector.extract_strided_slice %11 {offsets = [0, 256], sizes = [8, 128], strides = [1, 1]} : vector<8x512xf32> to vector<8x128xf32>
    %25 = math.tanh %24 : vector<8x128xf32>
    %26 = vector.extract_strided_slice %11 {offsets = [0, 384], sizes = [8, 128], strides = [1, 1]} : vector<8x512xf32> to vector<8x128xf32>
    %27 = arith.negf %26 : vector<8x128xf32>
    %28 = math.exp %27 : vector<8x128xf32>
    %cst_11 = arith.constant 1.000000e+00 : f32
    %29 = vector.broadcast %cst_11 : f32 to vector<8x128xf32>
    %30 = arith.addf %29, %28 : vector<8x128xf32>
    %31 = arith.divf %29, %30 : vector<8x128xf32>
    %32 = arith.mulf %23, %4 : vector<8x128xf32>
    %33 = arith.mulf %17, %25 : vector<8x128xf32>
    %34 = arith.addf %32, %33 : vector<8x128xf32>
    %35 = math.tanh %34 : vector<8x128xf32>
    %36 = arith.mulf %31, %35 : vector<8x128xf32>
    %cst_12 = arith.constant 1.000000e-01 : f32
    %37 = vector.broadcast %cst_12 : f32 to vector<8x128xf32>
    %38 = arith.mulf %37, %3 : vector<8x128xf32>
    %cst_13 = arith.constant 0.899999976 : f32
    %39 = vector.broadcast %cst_13 : f32 to vector<8x128xf32>
    %40 = arith.mulf %39, %36 : vector<8x128xf32>
    %41 = arith.addf %38, %40 : vector<8x128xf32>
    %cst_14 = arith.constant 1.000000e-01 : f32
    %42 = vector.broadcast %cst_14 : f32 to vector<8x128xf32>
    %43 = arith.mulf %42, %4 : vector<8x128xf32>
    %cst_15 = arith.constant 0.899999976 : f32
    %44 = vector.broadcast %cst_15 : f32 to vector<8x128xf32>
    %45 = arith.mulf %44, %34 : vector<8x128xf32>
    %46 = arith.addf %43, %45 : vector<8x128xf32>
    %47 = arith.index_cast %c0_i32_4 : i32 to index
    %c0_16 = arith.constant 0 : index
    %c0_17 = arith.constant 0 : index
    %48 = vector.load %arg6[%47, %c0_16, %c0_17] : memref<8x8x128xf32, #tpu.memory_space<vmem>>, vector<1x8x128xf32>
    %49 = vector.shape_cast %48 : vector<1x8x128xf32> to vector<8x128xf32>
    %50 = vector.shape_cast %41 : vector<8x128xf32> to vector<1x8x128xf32>
    tpu.vector_store %arg6[%47, %c0_16, %c0_17], %50 {strides = array<i32>} : memref<8x8x128xf32, #tpu.memory_space<vmem>>, vector<1x8x128xf32>,
    %c1_i32 = arith.constant 1 : i32
    %51 = arith.index_cast %c1_i32 : i32 to index
    %c0_18 = arith.constant 0 : index
    %c0_19 = arith.constant 0 : index
    %52 = vector.load %arg2[%51, %c0_18, %c0_19] : memref<8x8x512xf32, #tpu.memory_space<vmem>>, vector<1x8x512xf32>
    %53 = vector.shape_cast %52 : vector<1x8x512xf32> to vector<8x512xf32>
    %54 = arith.truncf %41 : vector<8x128xf32> to vector<8x128xbf16>
    %c0_20 = arith.constant 0 : index
    %c0_21 = arith.constant 0 : index
    %55 = vector.load %arg3[%c0_20, %c0_21] : memref<128x512xbf16, #tpu.memory_space<vmem>>, vector<128x512xbf16>
    %cst_22 = arith.constant dense<0.000000e+00> : vector<8x512xf32>
    %56 = tpu.matmul %54, %55, %cst_22 {dimension_numbers = #tpu.dot_dimension_numbers<[1], [0], [0], [1], [0, 0, 1, 1], [], []>} : vector<8x128xbf16>, vector<128x512xbf16>, vector<8x512xf32> -> vector<8x512xf32>
    %57 = arith.addf %53, %56 : vector<8x512xf32>
    %58 = vector.extract_strided_slice %57 {offsets = [0, 0], sizes = [8, 128], strides = [1, 1]} : vector<8x512xf32> to vector<8x128xf32>
    %59 = arith.negf %58 : vector<8x128xf32>
    %60 = math.exp %59 : vector<8x128xf32>
    %cst_23 = arith.constant 1.000000e+00 : f32
    %61 = vector.broadcast %cst_23 : f32 to vector<8x128xf32>
    %62 = arith.addf %61, %60 : vector<8x128xf32>
    %63 = arith.divf %61, %62 : vector<8x128xf32>
    %64 = vector.extract_strided_slice %57 {offsets = [0, 128], sizes = [8, 128], strides = [1, 1]} : vector<8x512xf32> to vector<8x128xf32>
    %65 = arith.negf %64 : vector<8x128xf32>
    %66 = math.exp %65 : vector<8x128xf32>
    %cst_24 = arith.constant 1.000000e+00 : f32
    %67 = vector.broadcast %cst_24 : f32 to vector<8x128xf32>
    %68 = arith.addf %67, %66 : vector<8x128xf32>
    %69 = arith.divf %67, %68 : vector<8x128xf32>
    %70 = vector.extract_strided_slice %57 {offsets = [0, 256], sizes = [8, 128], strides = [1, 1]} : vector<8x512xf32> to vector<8x128xf32>
    %71 = math.tanh %70 : vector<8x128xf32>
    %72 = vector.extract_strided_slice %57 {offsets = [0, 384], sizes = [8, 128], strides = [1, 1]} : vector<8x512xf32> to vector<8x128xf32>
    %73 = arith.negf %72 : vector<8x128xf32>
    %74 = math.exp %73 : vector<8x128xf32>
    %cst_25 = arith.constant 1.000000e+00 : f32
    %75 = vector.broadcast %cst_25 : f32 to vector<8x128xf32>
    %76 = arith.addf %75, %74 : vector<8x128xf32>
    %77 = arith.divf %75, %76 : vector<8x128xf32>
    %78 = arith.mulf %69, %46 : vector<8x128xf32>
    %79 = arith.mulf %63, %71 : vector<8x128xf32>
    %80 = arith.addf %78, %79 : vector<8x128xf32>
    %81 = math.tanh %80 : vector<8x128xf32>
    %82 = arith.mulf %77, %81 : vector<8x128xf32>
    %cst_26 = arith.constant 1.000000e-01 : f32
    %83 = vector.broadcast %cst_26 : f32 to vector<8x128xf32>
    %84 = arith.mulf %83, %41 : vector<8x128xf32>
    %cst_27 = arith.constant 0.899999976 : f32
    %85 = vector.broadcast %cst_27 : f32 to vector<8x128xf32>
    %86 = arith.mulf %85, %82 : vector<8x128xf32>
    %87 = arith.addf %84, %86 : vector<8x128xf32>
    %cst_28 = arith.constant 1.000000e-01 : f32
    %88 = vector.broadcast %cst_28 : f32 to vector<8x128xf32>
    %89 = arith.mulf %88, %46 : vector<8x128xf32>
    %cst_29 = arith.constant 0.899999976 : f32
    %90 = vector.broadcast %cst_29 : f32 to vector<8x128xf32>
    %91 = arith.mulf %90, %80 : vector<8x128xf32>
    %92 = arith.addf %89, %91 : vector<8x128xf32>
    %93 = arith.index_cast %c1_i32 : i32 to index
    %c0_30 = arith.constant 0 : index
    %c0_31 = arith.constant 0 : index
    %94 = vector.load %arg6[%93, %c0_30, %c0_31] : memref<8x8x128xf32, #tpu.memory_space<vmem>>, vector<1x8x128xf32>
    %95 = vector.shape_cast %94 : vector<1x8x128xf32> to vector<8x128xf32>
    %96 = vector.shape_cast %87 : vector<8x128xf32> to vector<1x8x128xf32>
    tpu.vector_store %arg6[%93, %c0_30, %c0_31], %96 {strides = array<i32>} : memref<8x8x128xf32, #tpu.memory_space<vmem>>, vector<1x8x128xf32>,
    %c2_i32 = arith.constant 2 : i32
    %97 = arith.index_cast %c2_i32 : i32 to index
    %c0_32 = arith.constant 0 : index
    %c0_33 = arith.constant 0 : index
    %98 = vector.load %arg2[%97, %c0_32, %c0_33] : memref<8x8x512xf32, #tpu.memory_space<vmem>>, vector<1x8x512xf32>
    %99 = vector.shape_cast %98 : vector<1x8x512xf32> to vector<8x512xf32>
    %100 = arith.truncf %87 : vector<8x128xf32> to vector<8x128xbf16>
    %c0_34 = arith.constant 0 : index
    %c0_35 = arith.constant 0 : index
    %101 = vector.load %arg3[%c0_34, %c0_35] : memref<128x512xbf16, #tpu.memory_space<vmem>>, vector<128x512xbf16>
    %cst_36 = arith.constant dense<0.000000e+00> : vector<8x512xf32>
    %102 = tpu.matmul %100, %101, %cst_36 {dimension_numbers = #tpu.dot_dimension_numbers<[1], [0], [0], [1], [0, 0, 1, 1], [], []>} : vector<8x128xbf16>, vector<128x512xbf16>, vector<8x512xf32> -> vector<8x512xf32>
    %103 = arith.addf %99, %102 : vector<8x512xf32>
    %104 = vector.extract_strided_slice %103 {offsets = [0, 0], sizes = [8, 128], strides = [1, 1]} : vector<8x512xf32> to vector<8x128xf32>
    %105 = arith.negf %104 : vector<8x128xf32>
    %106 = math.exp %105 : vector<8x128xf32>
    %cst_37 = arith.constant 1.000000e+00 : f32
    %107 = vector.broadcast %cst_37 : f32 to vector<8x128xf32>
    %108 = arith.addf %107, %106 : vector<8x128xf32>
    %109 = arith.divf %107, %108 : vector<8x128xf32>
    %110 = vector.extract_strided_slice %103 {offsets = [0, 128], sizes = [8, 128], strides = [1, 1]} : vector<8x512xf32> to vector<8x128xf32>
    %111 = arith.negf %110 : vector<8x128xf32>
    %112 = math.exp %111 : vector<8x128xf32>
    %cst_38 = arith.constant 1.000000e+00 : f32
    %113 = vector.broadcast %cst_38 : f32 to vector<8x128xf32>
    %114 = arith.addf %113, %112 : vector<8x128xf32>
    %115 = arith.divf %113, %114 : vector<8x128xf32>
    %116 = vector.extract_strided_slice %103 {offsets = [0, 256], sizes = [8, 128], strides = [1, 1]} : vector<8x512xf32> to vector<8x128xf32>
    %117 = math.tanh %116 : vector<8x128xf32>
    %118 = vector.extract_strided_slice %103 {offsets = [0, 384], sizes = [8, 128], strides = [1, 1]} : vector<8x512xf32> to vector<8x128xf32>
    %119 = arith.negf %118 : vector<8x128xf32>
    %120 = math.exp %119 : vector<8x128xf32>
    %cst_39 = arith.constant 1.000000e+00 : f32
    %121 = vector.broadcast %cst_39 : f32 to vector<8x128xf32>
    %122 = arith.addf %121, %120 : vector<8x128xf32>
    %123 = arith.divf %121, %122 : vector<8x128xf32>
    %124 = arith.mulf %115, %92 : vector<8x128xf32>
    %125 = arith.mulf %109, %117 : vector<8x128xf32>
    %126 = arith.addf %124, %125 : vector<8x128xf32>
    %127 = math.tanh %126 : vector<8x128xf32>
    %128 = arith.mulf %123, %127 : vector<8x128xf32>
    %cst_40 = arith.constant 1.000000e-01 : f32
    %129 = vector.broadcast %cst_40 : f32 to vector<8x128xf32>
    %130 = arith.mulf %129, %87 : vector<8x128xf32>
    %cst_41 = arith.constant 0.899999976 : f32
    %131 = vector.broadcast %cst_41 : f32 to vector<8x128xf32>
    %132 = arith.mulf %131, %128 : vector<8x128xf32>
    %133 = arith.addf %130, %132 : vector<8x128xf32>
    %cst_42 = arith.constant 1.000000e-01 : f32
    %134 = vector.broadcast %cst_42 : f32 to vector<8x128xf32>
    %135 = arith.mulf %134, %92 : vector<8x128xf32>
    %cst_43 = arith.constant 0.899999976 : f32
    %136 = vector.broadcast %cst_43 : f32 to vector<8x128xf32>
    %137 = arith.mulf %136, %126 : vector<8x128xf32>
    %138 = arith.addf %135, %137 : vector<8x128xf32>
    %139 = arith.index_cast %c2_i32 : i32 to index
    %c0_44 = arith.constant 0 : index
    %c0_45 = arith.constant 0 : index
    %140 = vector.load %arg6[%139, %c0_44, %c0_45] : memref<8x8x128xf32, #tpu.memory_space<vmem>>, vector<1x8x128xf32>
    %141 = vector.shape_cast %140 : vector<1x8x128xf32> to vector<8x128xf32>
    %142 = vector.shape_cast %133 : vector<8x128xf32> to vector<1x8x128xf32>
    tpu.vector_store %arg6[%139, %c0_44, %c0_45], %142 {strides = array<i32>} : memref<8x8x128xf32, #tpu.memory_space<vmem>>, vector<1x8x128xf32>,
    %c3_i32 = arith.constant 3 : i32
    %143 = arith.index_cast %c3_i32 : i32 to index
    %c0_46 = arith.constant 0 : index
    %c0_47 = arith.constant 0 : index
    %144 = vector.load %arg2[%143, %c0_46, %c0_47] : memref<8x8x512xf32, #tpu.memory_space<vmem>>, vector<1x8x512xf32>
    %145 = vector.shape_cast %144 : vector<1x8x512xf32> to vector<8x512xf32>
    %146 = arith.truncf %133 : vector<8x128xf32> to vector<8x128xbf16>
    %c0_48 = arith.constant 0 : index
    %c0_49 = arith.constant 0 : index
    %147 = vector.load %arg3[%c0_48, %c0_49] : memref<128x512xbf16, #tpu.memory_space<vmem>>, vector<128x512xbf16>
    %cst_50 = arith.constant dense<0.000000e+00> : vector<8x512xf32>
    %148 = tpu.matmul %146, %147, %cst_50 {dimension_numbers = #tpu.dot_dimension_numbers<[1], [0], [0], [1], [0, 0, 1, 1], [], []>} : vector<8x128xbf16>, vector<128x512xbf16>, vector<8x512xf32> -> vector<8x512xf32>
    %149 = arith.addf %145, %148 : vector<8x512xf32>
    %150 = vector.extract_strided_slice %149 {offsets = [0, 0], sizes = [8, 128], strides = [1, 1]} : vector<8x512xf32> to vector<8x128xf32>
    %151 = arith.negf %150 : vector<8x128xf32>
    %152 = math.exp %151 : vector<8x128xf32>
    %cst_51 = arith.constant 1.000000e+00 : f32
    %153 = vector.broadcast %cst_51 : f32 to vector<8x128xf32>
    %154 = arith.addf %153, %152 : vector<8x128xf32>
    %155 = arith.divf %153, %154 : vector<8x128xf32>
    %156 = vector.extract_strided_slice %149 {offsets = [0, 128], sizes = [8, 128], strides = [1, 1]} : vector<8x512xf32> to vector<8x128xf32>
    %157 = arith.negf %156 : vector<8x128xf32>
    %158 = math.exp %157 : vector<8x128xf32>
    %cst_52 = arith.constant 1.000000e+00 : f32
    %159 = vector.broadcast %cst_52 : f32 to vector<8x128xf32>
    %160 = arith.addf %159, %158 : vector<8x128xf32>
    %161 = arith.divf %159, %160 : vector<8x128xf32>
    %162 = vector.extract_strided_slice %149 {offsets = [0, 256], sizes = [8, 128], strides = [1, 1]} : vector<8x512xf32> to vector<8x128xf32>
    %163 = math.tanh %162 : vector<8x128xf32>
    %164 = vector.extract_strided_slice %149 {offsets = [0, 384], sizes = [8, 128], strides = [1, 1]} : vector<8x512xf32> to vector<8x128xf32>
    %165 = arith.negf %164 : vector<8x128xf32>
    %166 = math.exp %165 : vector<8x128xf32>
    %cst_53 = arith.constant 1.000000e+00 : f32
    %167 = vector.broadcast %cst_53 : f32 to vector<8x128xf32>
    %168 = arith.addf %167, %166 : vector<8x128xf32>
    %169 = arith.divf %167, %168 : vector<8x128xf32>
    %170 = arith.mulf %161, %138 : vector<8x128xf32>
    %171 = arith.mulf %155, %163 : vector<8x128xf32>
    %172 = arith.addf %170, %171 : vector<8x128xf32>
    %173 = math.tanh %172 : vector<8x128xf32>
    %174 = arith.mulf %169, %173 : vector<8x128xf32>
    %cst_54 = arith.constant 1.000000e-01 : f32
    %175 = vector.broadcast %cst_54 : f32 to vector<8x128xf32>
    %176 = arith.mulf %175, %133 : vector<8x128xf32>
    %cst_55 = arith.constant 0.899999976 : f32
    %177 = vector.broadcast %cst_55 : f32 to vector<8x128xf32>
    %178 = arith.mulf %177, %174 : vector<8x128xf32>
    %179 = arith.addf %176, %178 : vector<8x128xf32>
    %cst_56 = arith.constant 1.000000e-01 : f32
    %180 = vector.broadcast %cst_56 : f32 to vector<8x128xf32>
    %181 = arith.mulf %180, %138 : vector<8x128xf32>
    %cst_57 = arith.constant 0.899999976 : f32
    %182 = vector.broadcast %cst_57 : f32 to vector<8x128xf32>
    %183 = arith.mulf %182, %172 : vector<8x128xf32>
    %184 = arith.addf %181, %183 : vector<8x128xf32>
    %185 = arith.index_cast %c3_i32 : i32 to index
    %c0_58 = arith.constant 0 : index
    %c0_59 = arith.constant 0 : index
    %186 = vector.load %arg6[%185, %c0_58, %c0_59] : memref<8x8x128xf32, #tpu.memory_space<vmem>>, vector<1x8x128xf32>
    %187 = vector.shape_cast %186 : vector<1x8x128xf32> to vector<8x128xf32>
    %188 = vector.shape_cast %179 : vector<8x128xf32> to vector<1x8x128xf32>
    tpu.vector_store %arg6[%185, %c0_58, %c0_59], %188 {strides = array<i32>} : memref<8x8x128xf32, #tpu.memory_space<vmem>>, vector<1x8x128xf32>,
    %c4_i32 = arith.constant 4 : i32
    %189 = arith.index_cast %c4_i32 : i32 to index
    %c0_60 = arith.constant 0 : index
    %c0_61 = arith.constant 0 : index
    %190 = vector.load %arg2[%189, %c0_60, %c0_61] : memref<8x8x512xf32, #tpu.memory_space<vmem>>, vector<1x8x512xf32>
    %191 = vector.shape_cast %190 : vector<1x8x512xf32> to vector<8x512xf32>
    %192 = arith.truncf %179 : vector<8x128xf32> to vector<8x128xbf16>
    %c0_62 = arith.constant 0 : index
    %c0_63 = arith.constant 0 : index
    %193 = vector.load %arg3[%c0_62, %c0_63] : memref<128x512xbf16, #tpu.memory_space<vmem>>, vector<128x512xbf16>
    %cst_64 = arith.constant dense<0.000000e+00> : vector<8x512xf32>
    %194 = tpu.matmul %192, %193, %cst_64 {dimension_numbers = #tpu.dot_dimension_numbers<[1], [0], [0], [1], [0, 0, 1, 1], [], []>} : vector<8x128xbf16>, vector<128x512xbf16>, vector<8x512xf32> -> vector<8x512xf32>
    %195 = arith.addf %191, %194 : vector<8x512xf32>
    %196 = vector.extract_strided_slice %195 {offsets = [0, 0], sizes = [8, 128], strides = [1, 1]} : vector<8x512xf32> to vector<8x128xf32>
    %197 = arith.negf %196 : vector<8x128xf32>
    %198 = math.exp %197 : vector<8x128xf32>
    %cst_65 = arith.constant 1.000000e+00 : f32
    %199 = vector.broadcast %cst_65 : f32 to vector<8x128xf32>
    %200 = arith.addf %199, %198 : vector<8x128xf32>
    %201 = arith.divf %199, %200 : vector<8x128xf32>
    %202 = vector.extract_strided_slice %195 {offsets = [0, 128], sizes = [8, 128], strides = [1, 1]} : vector<8x512xf32> to vector<8x128xf32>
    %203 = arith.negf %202 : vector<8x128xf32>
    %204 = math.exp %203 : vector<8x128xf32>
    %cst_66 = arith.constant 1.000000e+00 : f32
    %205 = vector.broadcast %cst_66 : f32 to vector<8x128xf32>
    %206 = arith.addf %205, %204 : vector<8x128xf32>
    %207 = arith.divf %205, %206 : vector<8x128xf32>
    %208 = vector.extract_strided_slice %195 {offsets = [0, 256], sizes = [8, 128], strides = [1, 1]} : vector<8x512xf32> to vector<8x128xf32>
    %209 = math.tanh %208 : vector<8x128xf32>
    %210 = vector.extract_strided_slice %195 {offsets = [0, 384], sizes = [8, 128], strides = [1, 1]} : vector<8x512xf32> to vector<8x128xf32>
    %211 = arith.negf %210 : vector<8x128xf32>
    %212 = math.exp %211 : vector<8x128xf32>
    %cst_67 = arith.constant 1.000000e+00 : f32
    %213 = vector.broadcast %cst_67 : f32 to vector<8x128xf32>
    %214 = arith.addf %213, %212 : vector<8x128xf32>
    %215 = arith.divf %213, %214 : vector<8x128xf32>
    %216 = arith.mulf %207, %184 : vector<8x128xf32>
    %217 = arith.mulf %201, %209 : vector<8x128xf32>
    %218 = arith.addf %216, %217 : vector<8x128xf32>
    %219 = math.tanh %218 : vector<8x128xf32>
    %220 = arith.mulf %215, %219 : vector<8x128xf32>
    %cst_68 = arith.constant 1.000000e-01 : f32
    %221 = vector.broadcast %cst_68 : f32 to vector<8x128xf32>
    %222 = arith.mulf %221, %179 : vector<8x128xf32>
    %cst_69 = arith.constant 0.899999976 : f32
    %223 = vector.broadcast %cst_69 : f32 to vector<8x128xf32>
    %224 = arith.mulf %223, %220 : vector<8x128xf32>
    %225 = arith.addf %222, %224 : vector<8x128xf32>
    %cst_70 = arith.constant 1.000000e-01 : f32
    %226 = vector.broadcast %cst_70 : f32 to vector<8x128xf32>
    %227 = arith.mulf %226, %184 : vector<8x128xf32>
    %cst_71 = arith.constant 0.899999976 : f32
    %228 = vector.broadcast %cst_71 : f32 to vector<8x128xf32>
    %229 = arith.mulf %228, %218 : vector<8x128xf32>
    %230 = arith.addf %227, %229 : vector<8x128xf32>
    %231 = arith.index_cast %c4_i32 : i32 to index
    %c0_72 = arith.constant 0 : index
    %c0_73 = arith.constant 0 : index
    %232 = vector.load %arg6[%231, %c0_72, %c0_73] : memref<8x8x128xf32, #tpu.memory_space<vmem>>, vector<1x8x128xf32>
    %233 = vector.shape_cast %232 : vector<1x8x128xf32> to vector<8x128xf32>
    %234 = vector.shape_cast %225 : vector<8x128xf32> to vector<1x8x128xf32>
    tpu.vector_store %arg6[%231, %c0_72, %c0_73], %234 {strides = array<i32>} : memref<8x8x128xf32, #tpu.memory_space<vmem>>, vector<1x8x128xf32>,
    %c5_i32 = arith.constant 5 : i32
    %235 = arith.index_cast %c5_i32 : i32 to index
    %c0_74 = arith.constant 0 : index
    %c0_75 = arith.constant 0 : index
    %236 = vector.load %arg2[%235, %c0_74, %c0_75] : memref<8x8x512xf32, #tpu.memory_space<vmem>>, vector<1x8x512xf32>
    %237 = vector.shape_cast %236 : vector<1x8x512xf32> to vector<8x512xf32>
    %238 = arith.truncf %225 : vector<8x128xf32> to vector<8x128xbf16>
    %c0_76 = arith.constant 0 : index
    %c0_77 = arith.constant 0 : index
    %239 = vector.load %arg3[%c0_76, %c0_77] : memref<128x512xbf16, #tpu.memory_space<vmem>>, vector<128x512xbf16>
    %cst_78 = arith.constant dense<0.000000e+00> : vector<8x512xf32>
    %240 = tpu.matmul %238, %239, %cst_78 {dimension_numbers = #tpu.dot_dimension_numbers<[1], [0], [0], [1], [0, 0, 1, 1], [], []>} : vector<8x128xbf16>, vector<128x512xbf16>, vector<8x512xf32> -> vector<8x512xf32>
    %241 = arith.addf %237, %240 : vector<8x512xf32>
    %242 = vector.extract_strided_slice %241 {offsets = [0, 0], sizes = [8, 128], strides = [1, 1]} : vector<8x512xf32> to vector<8x128xf32>
    %243 = arith.negf %242 : vector<8x128xf32>
    %244 = math.exp %243 : vector<8x128xf32>
    %cst_79 = arith.constant 1.000000e+00 : f32
    %245 = vector.broadcast %cst_79 : f32 to vector<8x128xf32>
    %246 = arith.addf %245, %244 : vector<8x128xf32>
    %247 = arith.divf %245, %246 : vector<8x128xf32>
    %248 = vector.extract_strided_slice %241 {offsets = [0, 128], sizes = [8, 128], strides = [1, 1]} : vector<8x512xf32> to vector<8x128xf32>
    %249 = arith.negf %248 : vector<8x128xf32>
    %250 = math.exp %249 : vector<8x128xf32>
    %cst_80 = arith.constant 1.000000e+00 : f32
    %251 = vector.broadcast %cst_80 : f32 to vector<8x128xf32>
    %252 = arith.addf %251, %250 : vector<8x128xf32>
    %253 = arith.divf %251, %252 : vector<8x128xf32>
    %254 = vector.extract_strided_slice %241 {offsets = [0, 256], sizes = [8, 128], strides = [1, 1]} : vector<8x512xf32> to vector<8x128xf32>
    %255 = math.tanh %254 : vector<8x128xf32>
    %256 = vector.extract_strided_slice %241 {offsets = [0, 384], sizes = [8, 128], strides = [1, 1]} : vector<8x512xf32> to vector<8x128xf32>
    %257 = arith.negf %256 : vector<8x128xf32>
    %258 = math.exp %257 : vector<8x128xf32>
    %cst_81 = arith.constant 1.000000e+00 : f32
    %259 = vector.broadcast %cst_81 : f32 to vector<8x128xf32>
    %260 = arith.addf %259, %258 : vector<8x128xf32>
    %261 = arith.divf %259, %260 : vector<8x128xf32>
    %262 = arith.mulf %253, %230 : vector<8x128xf32>
    %263 = arith.mulf %247, %255 : vector<8x128xf32>
    %264 = arith.addf %262, %263 : vector<8x128xf32>
    %265 = math.tanh %264 : vector<8x128xf32>
    %266 = arith.mulf %261, %265 : vector<8x128xf32>
    %cst_82 = arith.constant 1.000000e-01 : f32
    %267 = vector.broadcast %cst_82 : f32 to vector<8x128xf32>
    %268 = arith.mulf %267, %225 : vector<8x128xf32>
    %cst_83 = arith.constant 0.899999976 : f32
    %269 = vector.broadcast %cst_83 : f32 to vector<8x128xf32>
    %270 = arith.mulf %269, %266 : vector<8x128xf32>
    %271 = arith.addf %268, %270 : vector<8x128xf32>
    %cst_84 = arith.constant 1.000000e-01 : f32
    %272 = vector.broadcast %cst_84 : f32 to vector<8x128xf32>
    %273 = arith.mulf %272, %230 : vector<8x128xf32>
    %cst_85 = arith.constant 0.899999976 : f32
    %274 = vector.broadcast %cst_85 : f32 to vector<8x128xf32>
    %275 = arith.mulf %274, %264 : vector<8x128xf32>
    %276 = arith.addf %273, %275 : vector<8x128xf32>
    %277 = arith.index_cast %c5_i32 : i32 to index
    %c0_86 = arith.constant 0 : index
    %c0_87 = arith.constant 0 : index
    %278 = vector.load %arg6[%277, %c0_86, %c0_87] : memref<8x8x128xf32, #tpu.memory_space<vmem>>, vector<1x8x128xf32>
    %279 = vector.shape_cast %278 : vector<1x8x128xf32> to vector<8x128xf32>
    %280 = vector.shape_cast %271 : vector<8x128xf32> to vector<1x8x128xf32>
    tpu.vector_store %arg6[%277, %c0_86, %c0_87], %280 {strides = array<i32>} : memref<8x8x128xf32, #tpu.memory_space<vmem>>, vector<1x8x128xf32>,
    %c6_i32 = arith.constant 6 : i32
    %281 = arith.index_cast %c6_i32 : i32 to index
    %c0_88 = arith.constant 0 : index
    %c0_89 = arith.constant 0 : index
    %282 = vector.load %arg2[%281, %c0_88, %c0_89] : memref<8x8x512xf32, #tpu.memory_space<vmem>>, vector<1x8x512xf32>
    %283 = vector.shape_cast %282 : vector<1x8x512xf32> to vector<8x512xf32>
    %284 = arith.truncf %271 : vector<8x128xf32> to vector<8x128xbf16>
    %c0_90 = arith.constant 0 : index
    %c0_91 = arith.constant 0 : index
    %285 = vector.load %arg3[%c0_90, %c0_91] : memref<128x512xbf16, #tpu.memory_space<vmem>>, vector<128x512xbf16>
    %cst_92 = arith.constant dense<0.000000e+00> : vector<8x512xf32>
    %286 = tpu.matmul %284, %285, %cst_92 {dimension_numbers = #tpu.dot_dimension_numbers<[1], [0], [0], [1], [0, 0, 1, 1], [], []>} : vector<8x128xbf16>, vector<128x512xbf16>, vector<8x512xf32> -> vector<8x512xf32>
    %287 = arith.addf %283, %286 : vector<8x512xf32>
    %288 = vector.extract_strided_slice %287 {offsets = [0, 0], sizes = [8, 128], strides = [1, 1]} : vector<8x512xf32> to vector<8x128xf32>
    %289 = arith.negf %288 : vector<8x128xf32>
    %290 = math.exp %289 : vector<8x128xf32>
    %cst_93 = arith.constant 1.000000e+00 : f32
    %291 = vector.broadcast %cst_93 : f32 to vector<8x128xf32>
    %292 = arith.addf %291, %290 : vector<8x128xf32>
    %293 = arith.divf %291, %292 : vector<8x128xf32>
    %294 = vector.extract_strided_slice %287 {offsets = [0, 128], sizes = [8, 128], strides = [1, 1]} : vector<8x512xf32> to vector<8x128xf32>
    %295 = arith.negf %294 : vector<8x128xf32>
    %296 = math.exp %295 : vector<8x128xf32>
    %cst_94 = arith.constant 1.000000e+00 : f32
    %297 = vector.broadcast %cst_94 : f32 to vector<8x128xf32>
    %298 = arith.addf %297, %296 : vector<8x128xf32>
    %299 = arith.divf %297, %298 : vector<8x128xf32>
    %300 = vector.extract_strided_slice %287 {offsets = [0, 256], sizes = [8, 128], strides = [1, 1]} : vector<8x512xf32> to vector<8x128xf32>
    %301 = math.tanh %300 : vector<8x128xf32>
    %302 = vector.extract_strided_slice %287 {offsets = [0, 384], sizes = [8, 128], strides = [1, 1]} : vector<8x512xf32> to vector<8x128xf32>
    %303 = arith.negf %302 : vector<8x128xf32>
    %304 = math.exp %303 : vector<8x128xf32>
    %cst_95 = arith.constant 1.000000e+00 : f32
    %305 = vector.broadcast %cst_95 : f32 to vector<8x128xf32>
    %306 = arith.addf %305, %304 : vector<8x128xf32>
    %307 = arith.divf %305, %306 : vector<8x128xf32>
    %308 = arith.mulf %299, %276 : vector<8x128xf32>
    %309 = arith.mulf %293, %301 : vector<8x128xf32>
    %310 = arith.addf %308, %309 : vector<8x128xf32>
    %311 = math.tanh %310 : vector<8x128xf32>
    %312 = arith.mulf %307, %311 : vector<8x128xf32>
    %cst_96 = arith.constant 1.000000e-01 : f32
    %313 = vector.broadcast %cst_96 : f32 to vector<8x128xf32>
    %314 = arith.mulf %313, %271 : vector<8x128xf32>
    %cst_97 = arith.constant 0.899999976 : f32
    %315 = vector.broadcast %cst_97 : f32 to vector<8x128xf32>
    %316 = arith.mulf %315, %312 : vector<8x128xf32>
    %317 = arith.addf %314, %316 : vector<8x128xf32>
    %cst_98 = arith.constant 1.000000e-01 : f32
    %318 = vector.broadcast %cst_98 : f32 to vector<8x128xf32>
    %319 = arith.mulf %318, %276 : vector<8x128xf32>
    %cst_99 = arith.constant 0.899999976 : f32
    %320 = vector.broadcast %cst_99 : f32 to vector<8x128xf32>
    %321 = arith.mulf %320, %310 : vector<8x128xf32>
    %322 = arith.addf %319, %321 : vector<8x128xf32>
    %323 = arith.index_cast %c6_i32 : i32 to index
    %c0_100 = arith.constant 0 : index
    %c0_101 = arith.constant 0 : index
    %324 = vector.load %arg6[%323, %c0_100, %c0_101] : memref<8x8x128xf32, #tpu.memory_space<vmem>>, vector<1x8x128xf32>
    %325 = vector.shape_cast %324 : vector<1x8x128xf32> to vector<8x128xf32>
    %326 = vector.shape_cast %317 : vector<8x128xf32> to vector<1x8x128xf32>
    tpu.vector_store %arg6[%323, %c0_100, %c0_101], %326 {strides = array<i32>} : memref<8x8x128xf32, #tpu.memory_space<vmem>>, vector<1x8x128xf32>,
    %c7_i32 = arith.constant 7 : i32
    %327 = arith.index_cast %c7_i32 : i32 to index
    %c0_102 = arith.constant 0 : index
    %c0_103 = arith.constant 0 : index
    %328 = vector.load %arg2[%327, %c0_102, %c0_103] : memref<8x8x512xf32, #tpu.memory_space<vmem>>, vector<1x8x512xf32>
    %329 = vector.shape_cast %328 : vector<1x8x512xf32> to vector<8x512xf32>
    %330 = arith.truncf %317 : vector<8x128xf32> to vector<8x128xbf16>
    %c0_104 = arith.constant 0 : index
    %c0_105 = arith.constant 0 : index
    %331 = vector.load %arg3[%c0_104, %c0_105] : memref<128x512xbf16, #tpu.memory_space<vmem>>, vector<128x512xbf16>
    %cst_106 = arith.constant dense<0.000000e+00> : vector<8x512xf32>
    %332 = tpu.matmul %330, %331, %cst_106 {dimension_numbers = #tpu.dot_dimension_numbers<[1], [0], [0], [1], [0, 0, 1, 1], [], []>} : vector<8x128xbf16>, vector<128x512xbf16>, vector<8x512xf32> -> vector<8x512xf32>
    %333 = arith.addf %329, %332 : vector<8x512xf32>
    %334 = vector.extract_strided_slice %333 {offsets = [0, 0], sizes = [8, 128], strides = [1, 1]} : vector<8x512xf32> to vector<8x128xf32>
    %335 = arith.negf %334 : vector<8x128xf32>
    %336 = math.exp %335 : vector<8x128xf32>
    %cst_107 = arith.constant 1.000000e+00 : f32
    %337 = vector.broadcast %cst_107 : f32 to vector<8x128xf32>
    %338 = arith.addf %337, %336 : vector<8x128xf32>
    %339 = arith.divf %337, %338 : vector<8x128xf32>
    %340 = vector.extract_strided_slice %333 {offsets = [0, 128], sizes = [8, 128], strides = [1, 1]} : vector<8x512xf32> to vector<8x128xf32>
    %341 = arith.negf %340 : vector<8x128xf32>
    %342 = math.exp %341 : vector<8x128xf32>
    %cst_108 = arith.constant 1.000000e+00 : f32
    %343 = vector.broadcast %cst_108 : f32 to vector<8x128xf32>
    %344 = arith.addf %343, %342 : vector<8x128xf32>
    %345 = arith.divf %343, %344 : vector<8x128xf32>
    %346 = vector.extract_strided_slice %333 {offsets = [0, 256], sizes = [8, 128], strides = [1, 1]} : vector<8x512xf32> to vector<8x128xf32>
    %347 = math.tanh %346 : vector<8x128xf32>
    %348 = vector.extract_strided_slice %333 {offsets = [0, 384], sizes = [8, 128], strides = [1, 1]} : vector<8x512xf32> to vector<8x128xf32>
    %349 = arith.negf %348 : vector<8x128xf32>
    %350 = math.exp %349 : vector<8x128xf32>
    %cst_109 = arith.constant 1.000000e+00 : f32
    %351 = vector.broadcast %cst_109 : f32 to vector<8x128xf32>
    %352 = arith.addf %351, %350 : vector<8x128xf32>
    %353 = arith.divf %351, %352 : vector<8x128xf32>
    %354 = arith.mulf %345, %322 : vector<8x128xf32>
    %355 = arith.mulf %339, %347 : vector<8x128xf32>
    %356 = arith.addf %354, %355 : vector<8x128xf32>
    %357 = math.tanh %356 : vector<8x128xf32>
    %358 = arith.mulf %353, %357 : vector<8x128xf32>
    %cst_110 = arith.constant 1.000000e-01 : f32
    %359 = vector.broadcast %cst_110 : f32 to vector<8x128xf32>
    %360 = arith.mulf %359, %317 : vector<8x128xf32>
    %cst_111 = arith.constant 0.899999976 : f32
    %361 = vector.broadcast %cst_111 : f32 to vector<8x128xf32>
    %362 = arith.mulf %361, %358 : vector<8x128xf32>
    %363 = arith.addf %360, %362 : vector<8x128xf32>
    %cst_112 = arith.constant 1.000000e-01 : f32
    %364 = vector.broadcast %cst_112 : f32 to vector<8x128xf32>
    %365 = arith.mulf %364, %322 : vector<8x128xf32>
    %cst_113 = arith.constant 0.899999976 : f32
    %366 = vector.broadcast %cst_113 : f32 to vector<8x128xf32>
    %367 = arith.mulf %366, %356 : vector<8x128xf32>
    %368 = arith.addf %365, %367 : vector<8x128xf32>
    %369 = arith.index_cast %c7_i32 : i32 to index
    %c0_114 = arith.constant 0 : index
    %c0_115 = arith.constant 0 : index
    %370 = vector.load %arg6[%369, %c0_114, %c0_115] : memref<8x8x128xf32, #tpu.memory_space<vmem>>, vector<1x8x128xf32>
    %371 = vector.shape_cast %370 : vector<1x8x128xf32> to vector<8x128xf32>
    %372 = vector.shape_cast %363 : vector<8x128xf32> to vector<1x8x128xf32>
    tpu.vector_store %arg6[%369, %c0_114, %c0_115], %372 {strides = array<i32>} : memref<8x8x128xf32, #tpu.memory_space<vmem>>, vector<1x8x128xf32>,
    %c8_i32 = arith.constant 8 : i32
    %c0_116 = arith.constant 0 : index
    %c0_117 = arith.constant 0 : index
    %373 = vector.load %arg9[%c0_116, %c0_117] : memref<8x128xf32, #tpu.memory_space<vmem>>, vector<8x128xf32>
    tpu.vector_store %arg9[%c0_116, %c0_117], %363 {strides = array<i32>} : memref<8x128xf32, #tpu.memory_space<vmem>>, vector<8x128xf32>,
    %c0_118 = arith.constant 0 : index
    %c0_119 = arith.constant 0 : index
    %374 = vector.load %arg10[%c0_118, %c0_119] : memref<8x128xf32, #tpu.memory_space<vmem>>, vector<8x128xf32>
    tpu.vector_store %arg10[%c0_118, %c0_119], %368 {strides = array<i32>} : memref<8x128xf32, #tpu.memory_space<vmem>>, vector<8x128xf32>,
    %c3_i32_120 = arith.constant 3 : i32
    %375 = arith.cmpi eq, %arg1, %c3_i32_120 : i32
    %376 = arith.extui %375 : i1 to i32
    %c0_i32_121 = arith.constant 0 : i32
    %377 = arith.cmpi ne, %376, %c0_i32_121 : i32
    scf.if %377 {
      %c0_122 = arith.constant 0 : index
      %c0_123 = arith.constant 0 : index
      %378 = vector.load %arg7[%c0_122, %c0_123] : memref<8x128xf32, #tpu.memory_space<vmem>>, vector<8x128xf32>
      tpu.vector_store %arg7[%c0_122, %c0_123], %363 {strides = array<i32>} : memref<8x128xf32, #tpu.memory_space<vmem>>, vector<8x128xf32>,
      %c0_124 = arith.constant 0 : index
      %c0_125 = arith.constant 0 : index
      %379 = vector.load %arg8[%c0_124, %c0_125] : memref<8x128xf32, #tpu.memory_space<vmem>>, vector<8x128xf32>
      tpu.vector_store %arg8[%c0_124, %c0_125], %368 {strides = array<i32>} : memref<8x128xf32, #tpu.memory_space<vmem>>, vector<8x128xf32>,
    } else {
    }
    return
  }
  func.func @transform_0(%arg0: i32, %arg1: i32) -> (i32, i32, i32) {
    %c0_i32 = arith.constant 0 : i32
    %c0_i32_0 = arith.constant 0 : i32
    return %arg1, %arg0, %c0_i32 : i32, i32, i32
  }
  func.func @transform_1(%arg0: i32, %arg1: i32) -> (i32, i32) {
    %c0_i32 = arith.constant 0 : i32
    %c0_i32_0 = arith.constant 0 : i32
    %c0_i32_1 = arith.constant 0 : i32
    return %c0_i32, %c0_i32_0 : i32, i32
  }
  func.func @transform_2(%arg0: i32, %arg1: i32) -> (i32, i32) {
    %c0_i32 = arith.constant 0 : i32
    %c0_i32_0 = arith.constant 0 : i32
    return %arg0, %c0_i32 : i32, i32
  }
  func.func @transform_3(%arg0: i32, %arg1: i32) -> (i32, i32) {
    %c0_i32 = arith.constant 0 : i32
    %c0_i32_0 = arith.constant 0 : i32
    return %arg0, %c0_i32 : i32, i32
  }
  func.func @transform_4(%arg0: i32, %arg1: i32) -> (i32, i32, i32) {
    %c0_i32 = arith.constant 0 : i32
    %c0_i32_0 = arith.constant 0 : i32
    return %arg1, %arg0, %c0_i32 : i32, i32, i32
  }
  func.func @transform_5(%arg0: i32, %arg1: i32) -> (i32, i32) {
    %c0_i32 = arith.constant 0 : i32
    %c0_i32_0 = arith.constant 0 : i32
    return %arg0, %c0_i32 : i32, i32
  }
  func.func @transform_6(%arg0: i32, %arg1: i32) -> (i32, i32) {
    %c0_i32 = arith.constant 0 : i32
    %c0_i32_0 = arith.constant 0 : i32
    return %arg0, %c0_i32 : i32, i32
  }
}

</mosaic_0001>

<bundles_post_ra>
// kernel: tpu_custom_call.1
= control target key start
LH: loop header
LB: loop body
LE: loop exit
PB: predicated region body
PF: predicated region fallthrough
CT: control target
= control target key end

     0   :  { %s4815_s0 = inlined_call_operand.hbm [shape: f32[32,8,512], index: 0, kind: input, shape index: {}]   ;;  %s4816_s1 = inlined_call_operand.hbm [shape: bf16[128,512], index: 1, kind: input, shape index: {}]   ;;  %s4817_s2 = inlined_call_operand.hbm [shape: f32[8,128], index: 2, kind: input, shape index: {}]   ;;  %s4818_s3 = inlined_call_operand.hbm [shape: f32[8,128], index: 3, kind: input, shape index: {}]   ;;  %s4819_s4 = inlined_call_operand.hbm [shape: f32[32,8,128], index: 4, kind: output, shape index: {0}]   ;;  %s4820_s5 = inlined_call_operand.hbm [shape: f32[8,128], index: 5, kind: output, shape index: {1}]   ;;  %s4821_s6 = inlined_call_operand.hbm [shape: f32[8,128], index: 6, kind: output, shape index: {2}]  }
   0x1   :  { %4826 = sst [smem:[#allocation21_spill]] %s4816_s1 }
   0x2   :  { %4827 = sst [smem:[#allocation22_spill]] %s4817_s2 }
   0x3   :  { %4828 = sst [smem:[#allocation23_spill]] %s4818_s3 }
   0x4   :  { %12 = vsyncpa [#allocation5], 0 }
   0x5   :  { %14 = vsyncpa [#allocation5 + $0x1], 0 }
   0x6   :  { %15 = vsyncpa [#allocation8], 0 }
   0x7   :  { %16 = vsyncpa [#allocation11], 0 }
   0x8   :  { %17 = vsyncpa [#allocation6], 0 }
   0x9   :  { %19 = vsyncpa [#allocation6 + $0x1], 0 }
   0xa   :  { %20 = vsyncpa [#allocation14], 0  ;;  %s4062_s21 = smov 0   ;;  %s4064_s22 = smov 0  }
   0xb   :  { %s4066_s23 = smov 0   ;;  %s4068_s24 = smov 0  }
   0xc   :  { %s4070_s25 = smov 0   ;;  %s4072_s26 = smov 0  }
   0xd LB: > { %s3081_s27 = sadd.s32 4294967295, %s4011_s26   ;;  %s3082_s28 = sadd.s32 4294967294, %s4011_s26   ;;  %s4011_s26 = sphi %s4072_s26, %s26_s26   ;;  %s4007_s25 = sphi %s4070_s25, %s4848_s25   ;;  %s4003_s24 = sphi %s4068_s24, %s4847_s24   ;;  %s3999_s23 = sphi %s4066_s23, %s4846_s23   ;;  %s3995_s22 = sphi %s4064_s22, %s4845_s22   ;;  %s3991_s21 = sphi %s4062_s21, %s4844_s21  }
   0xe   : > { %p60_p0 = scmp.ne.s32.totalorder %s3995_s22, %s3991_s21  ;;  %p4096_p1 = scmp.eq.s32.totalorder %s3081_s27, 0 }
   0xf   : > { %p4100_p2 = scmp.eq.s32.totalorder %s3081_s27, 3  ;;  %p165_p3 = scmp.eq.s32.totalorder %s3082_s28, 3 }
  0x10   : > { %s4829_s29 = scalar_select %p4096_p1, 1, 0 }
  0x11   : > { %p4106_p4 = por %p4096_p1, %p60_p0  ;;  %p3083_p5 = scmp.ge.s32.totalorder %s4011_s26, 1 }
  0x12   : > { %p4111_p6 = por %p165_p3, %p60_p0  ;;  %p224_p7 = scmp.lt.s32.totalorder %s4011_s26, 5 }
  0x13   : > { %s4831_s7 = scalar_select %p4106_p4, 1, 0 }
  0x14   : > { %s4832_s8 = scalar_select %p4111_p6, 1, 0 }
  0x15   : > { %p4116_p8 = pnand %p3083_p5, %p224_p7  ;;  %s4013_s10 = smov [#allocation7]  }
  0x16   : > { %s236_s11 = sshll.u32 %s4013_s10, 4  ;;  %s4014_s13 = smov [#allocation9]   ;;  %s237_s11 = int_to_ptr.vmem [resolvable:$true] %s236_s11 }
  0x17   : > { %s4833_s9 = scalar_select %p4116_p8, 1, 0 }
  0x18   : > { %p3451_p9 = pneg %p4116_p8  ;;  %s252_s14 = sshll.u32 %s4014_s13, 4  ;;  %s253_s14 = int_to_ptr.vmem [resolvable:$true] %s252_s14 }
  0x19   : > { %s4015_s15 = smov [#allocation10]   ;;  %s3776_s17 = scalar_lea.vmem %s237_s11, 4096 }
  0x1a   : > { %p4124_p10 = pnand %p3451_p9, %p4096_p1  ;;  %s265_s16 = sshll.u32 %s4015_s15, 4  ;;  %s266_s16 = int_to_ptr.vmem [resolvable:$true] %s265_s16 }
  0x1b   : > { %p3777_p12 = scmp.ne.s32.totalorder %s237_s11, %s3776_s17  ;;  %p3784_p3 = scmp.lt.s32.totalorder %s237_s11, %s237_s11 }
  0x1c   : > { %p3767_p11 = pneg %p4124_p10  ;;  %p3785_p5 = scmp.lt.s32.totalorder %s3776_s17, %s3776_s17 }
  0x1e   : > { %p3779_p13 = pnand %p3777_p12, %p3767_p11  ;;  %p3786_p7 = por %p3785_p5, %p3784_p3 }
  0x20   : > { %p3780_p0 = pneg %p3779_p13 }
  0x22   : > { %p3787_p9 = pnand %p3786_p7, %p3780_p0 }
  0x24   : > { %3790 = shalt.err (!%p3787_p9)
}
  0x25   : > { %s4016_s18 = smov 256   ;;  %s4017_s19 = smov 16  }
  0x26   : > { %s4835_s1 = sld [smem:[#allocation21_spill]]  ;;  %s3802_s28 = scalar_lea.vmem %s253_s14, 128 }
  0x27   : > { %p3803_p6 = scmp.ne.s32.totalorder %s253_s14, %s3802_s28  ;;  %p3810_p1 = scmp.lt.s32.totalorder %s253_s14, %s253_s14 }
  0x28   : > { %p3811_p4 = scmp.lt.s32.totalorder %s3802_s28, %s3802_s28 }
  0x29   : > { %p3805_p12 = pnand %p3803_p6, %p3767_p11 }
  0x2a   : > { %p3812_p3 = por %p3811_p4, %p3810_p1 }
  0x2b   : > { %p3806_p13 = pneg %p3805_p12 }
  0x2c   : > { %3454 = dma.hbm_to_vmem [thread:$0]  (!%p4124_p10), %s4835_s1, 4096, %s237_s11, [#allocation8], %s4016_s18, %s4016_s18, %s4017_s19  }
  0x2d   : > { %p3813_p0 = pnand %p3812_p3, %p3806_p13 }
  0x2f   : > { %3816 = shalt.err (!%p3813_p0)
}
  0x30   : > { %s4836_s2 = sld [smem:[#allocation22_spill]]  ;;  %s3828_s11 = scalar_lea.vmem %s266_s16, 128 }
  0x31   : > { %p3829_p5 = scmp.ne.s32.totalorder %s266_s16, %s3828_s11  ;;  %p3836_p9 = scmp.lt.s32.totalorder %s266_s16, %s266_s16 }
  0x32   : > { %p3837_p12 = scmp.lt.s32.totalorder %s3828_s11, %s3828_s11 }
  0x33   : > { %p3831_p7 = pnand %p3829_p5, %p3767_p11 }
  0x34   : > { %p3838_p8 = por %p3837_p12, %p3836_p9 }
  0x35   : > { %p3832_p6 = pneg %p3831_p7 }
  0x36   : > { %3457 = dma.hbm_to_vmem [thread:$0]  (!%p4124_p10), %s4836_s2, 128, %s253_s14, [#allocation8]  }
  0x37   : > { %p3839_p1 = pnand %p3838_p8, %p3832_p6 }
  0x39   : > { %3842 = shalt.err (!%p3839_p1)
}
  0x3a   : > { %s4837_s3 = sld [smem:[#allocation23_spill]]  ;;  %s47_s14 = sadd.s32 1, %s3999_s23 }
  0x3b   : > { %s35_s18 = sadd.s32 1, %s4007_s25  ;;  %p54_p4 = scmp.ne.s32.totalorder %s3999_s23, %s3995_s22 }
  0x3c   : > { %p36_p8 = scmp.ge.s32.totalorder %s35_s18, 4  ;;  %p55_p11 = scmp.eq.s32.totalorder %s4011_s26, 0 }
  0x3d   : > { %p4161_p13 = por %p4100_p2, %p54_p4  ;;  %p3472_p3 = scmp.lt.s32.totalorder %s4011_s26, 4 }
  0x3e   : > { %s4850_s18 = smov (%p36_p8, %s35_s18), 0  ;;  %p56_p0 = por %p55_p11, %p54_p4 }
  0x3f   : > { %s276_s19 = sand.u32 1, %s3999_s23   ;;  %s42_s20 = ssub.s32 %s4007_s25, %s4850_s18 }
  0x40   : > { %3460 = dma.hbm_to_vmem [thread:$0]  (!%p4124_p10), %s4837_s3, 128, %s266_s16, [#allocation11]  }
  0x41   : > { %p45_p5 = scmp.eq.s32.totalorder %s42_s20, 0  ;;  %s3088_s16 = sshll.u32 %s276_s19, 8 }
  0x42   : > { %s3425_s27 = sshll.u32 %s4007_s25, 12  ;;  %s280_s15 = scalar_lea.vmem [#allocation4], %s3088_s16 }
  0x43   : > { %s4173_s28 = scalar_select %p45_p5, %s3999_s23, %s47_s14  }
  0x44   : > { %s289_s11 = scalar_lea.hbm %s4815_s0, %s3425_s27  ;;  %s290_s17 = sshll.u32 %s280_s15, 4  ;;  %s291_s17 = int_to_ptr.vmem [resolvable:$true] %s290_s17 }
  0x45   : > { %p4180_p10 = pnand %p3472_p3, %p56_p0  ;;  %s277_s2 = scalar_lea.sflag [#allocation5], %s276_s19 }
  0x46   : > { %s3856_s20 = scalar_lea.vmem %s291_s17, 4096  ;;  %s4018_s14 = smov [#allocation4]  }
  0x47   : > { %p3845_p7 = pneg %p4180_p10  ;;  %p3857_p6 = scmp.ne.s32.totalorder %s291_s17, %s3856_s20 }
  0x48   : > { %s3861_s3 = sshll.u32 %s4018_s14, 4  ;;  %s3862_s3 = int_to_ptr.vmem [resolvable:$false] %s3861_s3 }
  0x49   : > { %p3859_p9 = pnand %p3857_p6, %p3845_p7  ;;  %s3863_s27 = scalar_lea.vmem %s3862_s3, 8192 }
  0x4a   : > { %p3864_p1 = scmp.lt.s32.totalorder %s291_s17, %s3862_s3  ;;  %p3865_p4 = scmp.lt.s32.totalorder %s3863_s27, %s3856_s20 }
  0x4b   : > { %p3860_p12 = pneg %p3859_p9 }
  0x4c   : > { %p3866_p8 = por %p3865_p4, %p3864_p1 }
  0x4e   : > { %p3867_p11 = pnand %p3866_p8, %p3860_p12 }
  0x50   : > { %3870 = shalt.err (!%p3867_p11)
}
  0x51   : > { %s4019_s16 = smov 512   ;;  %s4020_s10 = smov 32  }
  0x52   : > { %3464 = dma.hbm_to_vmem [thread:$0]  (!%p4180_p10), %s289_s11, 4096, %s291_s17, %s277_s2, %s4019_s16, %s4019_s16, %s4020_s10  }
  0x53   : > { %p4840_p3 = scmp.ne.s32.totalorder %s4833_s9, 0 }
  0x54   : > { %s4191_s19 = sand.u32 (!%p4840_p3), 1, %s3995_s22   ;;  %p4841_p0 = scmp.ne.s32.totalorder (!%p4840_p3), %s4831_s7, 0 }
  0x55   : > { %302 = sbr.rel (%p4840_p3) target bundleno = 2231 (0x8b7), region = 36  ;;  %s3093_s13 = sshll.u32 (!%p4840_p3), %s4191_s19, 8 }
  0x56   : > { %s305_s3 = scalar_lea.sflag (!%p4840_p3), [#allocation5], %s4191_s19  ;;  %s4195_s15 = scalar_lea.vmem (!%p4840_p3), [#allocation4], %s3093_s13 }
  0x5a   : > { %3970 = dma.done.wait (%p4841_p0), %s305_s3, 4096  }
  0x5b   : > { %3972 = vsyncadd (%p4841_p0), %s305_s3, 4294963200  ;;  %p4842_p5 = scmp.ne.s32.totalorder %s4829_s29, 0 }
  0x5d   : > { %3974 = dma.done.wait (%p4842_p5), [#allocation8], 4224  }
  0x5e   : > { %3976 = vsyncadd (%p4842_p5), [#allocation8], 4294963072 }
  0x5f   : > { %3978 = dma.done.wait (%p4842_p5), [#allocation11], 128  }
  0x60   : > { %3980 = vsyncadd (%p4842_p5), [#allocation11], 4294967168  ;;  %s3097_s1 = sshll.u32 %s4191_s19, 6  ;;  %p3098_p10 = scmp.ne.s32.totalorder %s4003_s24, 0 }
  0x61   : > { %s4210_s2 = scalar_lea.vmem [#allocation12], %s3097_s1 }
  0x62   : > { %355 = sbr.rel (%p3098_p10) target bundleno = 105 (0x69), region = 56 }
  0x67   : > { %v356_v0 = vld [vmem:[#allocation9] sm:$0xff]  ;;  %v358_v1 = vld [vmem:[#allocation10] sm:$0xff] }
  0x68   : > { %357 = vst [vmem:[#allocation2] sm:$0xff] %v356_v0  ;;  %359 = vst [vmem:[#allocation3] sm:$0xff] %v358_v1 }
  0x69 PF: > { %v4213_v2 = vld [vmem:[#allocation7 + $0xe4] ss:$16 sps:$4 sm:$0xff]   ;;  %v4215_v3 = vld [vmem:[#allocation7 + $0xe0] ss:$16 sps:$4 sm:$0xff]   ;;  %v4021_v4 = vmov 0   ;;  %v363_v39 = vld [vmem:[%s4195_s15 + $0x8] sm:$0xff] }
  0x6a   : > { %591 = vmatprep.mubr.bf16.mxu0 %v4021_v4  ;;  %632 = vmatprep.mubr.bf16.mxu1 %v4021_v4  ;;  %v4220_v5 = vld [vmem:[#allocation7 + $0xc4] ss:$16 sps:$4 sm:$0xff]   ;;  %v4223_v6 = vld [vmem:[#allocation7 + $0xc0] ss:$16 sps:$4 sm:$0xff]   ;;  %v4228_v8 = vld [vmem:[#allocation7 + $0xec] ss:$16 sps:$4 sm:$0xff]  }
  0x6b   : > { %559 = vmatprep.subr.bf16.mxu0 %v4213_v2  ;;  %v4226_v7 = vld [vmem:[#allocation7 + $0xa4] ss:$16 sps:$4 sm:$0xff]   ;;  %v4230_v9 = vld [vmem:[#allocation7 + $0xe8] ss:$16 sps:$4 sm:$0xff]   ;;  %v4233_v10 = vld [vmem:[#allocation7 + $0xa0] ss:$16 sps:$4 sm:$0xff]   ;;  %600 = vmatprep.subr.bf16.mxu1 %v4228_v8 }
  0x6c   : > { %560 = vmatpush1.bf16.msra.mxu0 %v4215_v3  ;;  %v4237_v11 = vld [vmem:[#allocation7 + $0x84] ss:$16 sps:$4 sm:$0xff]   ;;  %601 = vmatpush1.bf16.msra.mxu1 %v4230_v9  ;;  %v4240_v12 = vld [vmem:[#allocation7 + $0xcc] ss:$16 sps:$4 sm:$0xff]   ;;  %v4242_v13 = vld [vmem:[#allocation7 + $0xc8] ss:$16 sps:$4 sm:$0xff]  }
  0x6d   : > { %561 = vmatprep.subr.bf16.mxu0 %v4220_v5  ;;  %602 = vmatprep.subr.bf16.mxu1 %v4240_v12  ;;  %v4246_v14 = vld [vmem:[#allocation7 + $0x80] ss:$16 sps:$4 sm:$0xff]   ;;  %v4248_v15 = vld [vmem:[#allocation7 + $0x64] ss:$16 sps:$4 sm:$0xff]   ;;  %v4250_v16 = vld [vmem:[#allocation7 + $0xac] ss:$16 sps:$4 sm:$0xff]  }
  0x6e   : > { %v4254_v17 = vld [vmem:[#allocation7 + $0xa8] ss:$16 sps:$4 sm:$0xff]   ;;  %v4257_v18 = vld [vmem:[#allocation7 + $0x8c] ss:$16 sps:$4 sm:$0xff]   ;;  %v4260_v19 = vld [vmem:[#allocation7 + $0x60] ss:$16 sps:$4 sm:$0xff]  }
  0x6f   : > { %v4263_v20 = vld [vmem:[#allocation7 + $0x44] ss:$16 sps:$4 sm:$0xff]   ;;  %v4266_v21 = vld [vmem:[#allocation7 + $0x88] ss:$16 sps:$4 sm:$0xff]   ;;  %v4269_v22 = vld [vmem:[#allocation7 + $0x6c] ss:$16 sps:$4 sm:$0xff]  }
  0x70   : > { %562 = vmatpush1.bf16.msra.mxu0 %v4223_v6  ;;  %603 = vmatpush1.bf16.msra.mxu1 %v4242_v13  ;;  %v4272_v23 = vld [vmem:[#allocation7 + $0x40] ss:$16 sps:$4 sm:$0xff]   ;;  %v4274_v24 = vld [vmem:[#allocation7 + $0x24] ss:$16 sps:$4 sm:$0xff]   ;;  %v4278_v25 = vld [vmem:[#allocation7 + $0x68] ss:$16 sps:$4 sm:$0xff]  }
  0x71   : > { %563 = vmatprep.subr.bf16.mxu0 %v4226_v7  ;;  %604 = vmatprep.subr.bf16.mxu1 %v4250_v16  ;;  %v4280_v26 = vld [vmem:[#allocation7 + $0x20] ss:$16 sps:$4 sm:$0xff]   ;;  %v4283_v27 = vld [vmem:[#allocation7 + $0x4c] ss:$16 sps:$4 sm:$0xff]   ;;  %v4285_v28 = vld [vmem:[#allocation7 + $0x4] ss:$16 sps:$4 sm:$0xff]  }
  0x72   : > { %v4287_v29 = vld [vmem:[#allocation7 + $0x48] ss:$16 sps:$4 sm:$0xff]   ;;  %v4290_v30 = vld [vmem:[#allocation7 + $0x2c] ss:$16 sps:$4 sm:$0xff]   ;;  %v4294_v31 = vld [vmem:[#allocation7] ss:$16 sps:$4 sm:$0xff]  }
  0x73   : > { %v4296_v32 = vld [vmem:[#allocation2] sm:$0xff]  ;;  %v4299_v33 = vld [vmem:[#allocation7 + $0x28] ss:$16 sps:$4 sm:$0xff]   ;;  %v4302_v34 = vld [vmem:[#allocation7 + $0xc] ss:$16 sps:$4 sm:$0xff]   ;;  %p3414_p7 = scmp.ne.s32.totalorder %s4003_s24, 3 }
  0x74   : > { %564 = vmatpush1.bf16.msra.mxu0 %v4233_v10  ;;  %605 = vmatpush1.bf16.msra.mxu1 %v4254_v17  ;;  %v366_v35 = vpack.c.bf16 %v4296_v32, %v4296_v32  ;;  %v4311_v36 = vld [vmem:[#allocation7 + $0x8] ss:$16 sps:$4 sm:$0xff]   ;;  %v362_v37 = vld [vmem:[%s4195_s15] sm:$0xff]  ;;  %v364_v52 = vld [vmem:[%s4195_s15 + $0x10] sm:$0xff] }
  0x75   : > { %565 = vmatprep.subr.bf16.mxu0 %v4237_v11  ;;  %606 = vmatprep.subr.bf16.mxu1 %v4257_v18  ;;  %v365_v49 = vld [vmem:[%s4195_s15 + $0x18] sm:$0xff] }
  0x76   : > { %v4355_v63 = vld [vmem:[#allocation3] sm:$0xff] }
  0x78   : > { %566 = vmatpush1.bf16.msra.mxu0 %v4246_v14  ;;  %607 = vmatpush1.bf16.msra.mxu1 %v4266_v21 }
  0x79   : > { %567 = vmatprep.subr.bf16.mxu0 %v4248_v15  ;;  %608 = vmatprep.subr.bf16.mxu1 %v4269_v22 }
  0x7c   : > { %568 = vmatpush1.bf16.msra.mxu0 %v4260_v19  ;;  %609 = vmatpush1.bf16.msra.mxu1 %v4278_v25 }
  0x7d   : > { %569 = vmatprep.subr.bf16.mxu0 %v4263_v20  ;;  %610 = vmatprep.subr.bf16.mxu1 %v4283_v27 }
  0x80   : > { %570 = vmatpush1.bf16.msra.mxu0 %v4272_v23  ;;  %611 = vmatpush1.bf16.msra.mxu1 %v4287_v29 }
  0x81   : > { %571 = vmatprep.subr.bf16.mxu0 %v4274_v24  ;;  %612 = vmatprep.subr.bf16.mxu1 %v4290_v30 }
  0x84   : > { %572 = vmatpush1.bf16.msra.mxu0 %v4280_v26  ;;  %613 = vmatpush1.bf16.msra.mxu1 %v4299_v33 }
  0x85   : > { %573 = vmatprep.subr.bf16.mxu0 %v4285_v28  ;;  %614 = vmatprep.subr.bf16.mxu1 %v4302_v34 }
  0x88   : > { %574 = vmatpush1.bf16.msra.mxu0 %v4294_v31  ;;  %615 = vmatpush1.bf16.msra.mxu1 %v4311_v36 }
  0x89   : > { %874 = vmatprep.subr.bf16.mxu0 %v4213_v2  ;;  %915 = vmatprep.subr.bf16.mxu1 %v4228_v8 }
  0x8b   : > { %592 = vmatmul.mubr.bf16.vlgmr.msra.gmra.mxu0 %v366_v35  ;;  %633 = vmatmul.mubr.bf16.vlgmr.msra.gmra.mxu1 %v366_v35 }
  0x8c   : > { %875 = vmatpush1.bf16.msra.mxu0 %v4215_v3  ;;  %906 = vmatprep.mubr.bf16.mxu0 %v4021_v4 }
  0x8d   : > { %876 = vmatprep.subr.bf16.mxu0 %v4220_v5  ;;  %916 = vmatpush1.bf16.msra.mxu1 %v4230_v9 }
  0x8e   : > { %917 = vmatprep.subr.bf16.mxu1 %v4240_v12  ;;  %947 = vmatprep.mubr.bf16.mxu1 %v4021_v4 }
  0x90   : > { %877 = vmatpush1.bf16.msra.mxu0 %v4223_v6 }
  0x91   : > { %878 = vmatprep.subr.bf16.mxu0 %v4226_v7  ;;  %918 = vmatpush1.bf16.msra.mxu1 %v4242_v13 }
  0x92   : > { %919 = vmatprep.subr.bf16.mxu1 %v4250_v16 }
  0x94   : > { %879 = vmatpush1.bf16.msra.mxu0 %v4233_v10 }
  0x95   : > { %880 = vmatprep.subr.bf16.mxu0 %v4237_v11  ;;  %920 = vmatpush1.bf16.msra.mxu1 %v4254_v17 }
  0x96   : > { %921 = vmatprep.subr.bf16.mxu1 %v4257_v18 }
  0x98   : > { %881 = vmatpush1.bf16.msra.mxu0 %v4246_v14 }
  0x99   : > { %882 = vmatprep.subr.bf16.mxu0 %v4248_v15  ;;  %922 = vmatpush1.bf16.msra.mxu1 %v4266_v21 }
  0x9a   : > { %923 = vmatprep.subr.bf16.mxu1 %v4269_v22 }
  0x9c   : > { %883 = vmatpush1.bf16.msra.mxu0 %v4260_v19 }
  0x9d   : > { %884 = vmatprep.subr.bf16.mxu0 %v4263_v20  ;;  %924 = vmatpush1.bf16.msra.mxu1 %v4278_v25 }
  0x9e   : > { %925 = vmatprep.subr.bf16.mxu1 %v4283_v27 }
  0xa0   : > { %885 = vmatpush1.bf16.msra.mxu0 %v4272_v23 }
  0xa1   : > { %886 = vmatprep.subr.bf16.mxu0 %v4274_v24  ;;  %926 = vmatpush1.bf16.msra.mxu1 %v4287_v29 }
  0xa2   : > { %927 = vmatprep.subr.bf16.mxu1 %v4290_v30 }
  0xa4   : > { %887 = vmatpush1.bf16.msra.mxu0 %v4280_v26 }
  0xa5   : > { %888 = vmatprep.subr.bf16.mxu0 %v4285_v28  ;;  %928 = vmatpush1.bf16.msra.mxu1 %v4299_v33 }
  0xa6   : > { %929 = vmatprep.subr.bf16.mxu1 %v4302_v34 }
  0xa8   : > { %889 = vmatpush1.bf16.msra.mxu0 %v4294_v31 }
  0xa9   : > { %1190 = vmatprep.subr.bf16.mxu0 %v4213_v2  ;;  %930 = vmatpush1.bf16.msra.mxu1 %v4311_v36 }
  0xaa   : > { %1231 = vmatprep.subr.bf16.mxu1 %v4228_v8 }
 0x14b   : > { %v593_v38 = vpop.f32.mrf.mxu0  ;;  %v634_v46 = vpop.f32.mrf.mxu1 }
 0x14c   : > { %v641_v40 = vadd.f32 %v593_v38, %v362_v37  ;;  %v643_v54 = vadd.f32 %v634_v46, %v364_v52 }
 0x14d   : > { %v595_v41 = vpop.f32.mrf.mxu0  ;;  %v636_v48 = vpop.f32.mrf.mxu1 }
 0x14e   : > { %v3131_v42 = vmul.f32 -1.442695, %v641_v40  ;;  %v642_v43 = vadd.f32 %v595_v41, %v363_v39  ;;  %v644_v53 = vadd.f32 %v636_v48, %v365_v49  ;;  %v669_v41 = vmul.f32 0.1, %v4296_v32  ;;  %v3134_v32 = vld [vmem:[%s4195_s15 + $0x20] sm:$0xff]  ;;  %v3135_v48 = vld [vmem:[%s4195_s15 + $0x28] sm:$0xff] }
 0x14f   : > { %v597_v44 = vpop.f32.mrf.mxu0  ;;  %v638_v50 = vpop.f32.mrf.mxu1 }
 0x150   : > { %3637 = vpow2.f32 %v3131_v42  ;;  %v3132_v45 = vmul.f32 -1.442695, %v642_v43  ;;  %v3133_v55 = vmul.f32 -1.442695, %v644_v53 }
 0x151   : > { %v598_v47 = vpop.f32.mrf.mxu0  ;;  %v639_v51 = vpop.f32.mrf.mxu1 }
 0x152   : > { %3639 = vpow2.f32 %v3132_v45 }
 0x153   : > { %3641 = vtanh.f32 %v643_v54 }
 0x154   : > { %3643 = vpow2.f32 %v3133_v55 }
 0x15d   : > { %v3638_v56 = vpop.eup %3637 }
 0x15e   : > { %v648_v57 = vadd.f32 1.0, %v3638_v56 }
 0x15f   : > { %v3640_v58 = vpop.eup %3639 }
 0x160   : > { %3645 = vrcp.f32 %v648_v57  ;;  %v654_v59 = vadd.f32 1.0, %v3640_v58  ;;  %v3642_v60 = vpop.eup %3641 }
 0x161   : > { %v3644_v61 = vpop.eup %3643 }
 0x162   : > { %3647 = vrcp.f32 %v654_v59  ;;  %v661_v1 = vadd.f32 1.0, %v3644_v61  ;;  %v3136_v59 = vld [vmem:[%s4195_s15 + $0x30] sm:$0xff] }
 0x164   : > { %3649 = vrcp.f32 %v661_v1 }
 0x16d   : > { %v3646_v62 = vpop.eup %3645 }
 0x16e   : > { %v665_v37 = vmul.f32 %v3646_v62, %v3642_v60 }
 0x16f   : > { %v3648_v0 = vpop.eup %3647 }
 0x170   : > { %v664_v35 = vmul.f32 %v3648_v0, %v4355_v63 }
 0x171   : > { %v3650_v39 = vpop.eup %3649 }
 0x172   : > { %v4358_v38 = vadd.f32 %v665_v37, %v664_v35  ;;  %v672_v37 = vmul.f32 0.1, %v4355_v63 }
 0x174   : > { %3651 = vtanh.f32 %v4358_v38 }
 0x181   : > { %v3652_v40 = vpop.eup %3651 }
 0x182   : > { %v668_v42 = vmul.f32 %v3652_v40, %v3650_v39  ;;  %v673_v39 = vmul.f32 0.9, %v4358_v38 }
 0x184   : > { %v670_v43 = vmul.f32 0.9, %v668_v42 }
 0x186   : > { %v4362_v44 = vadd.f32 %v670_v43, %v669_v41  ;;  %v4408_v43 = vadd.f32 %v673_v39, %v672_v37  ;;  %v4486_v37 = vld [vmem:[#allocation7 + $0xc4] ss:$16 sps:$4 sm:$0xff]   ;;  %v4488_v39 = vld [vmem:[#allocation7 + $0xcc] ss:$16 sps:$4 sm:$0xff]  }
 0x188   : > { %675 = vst [vmem:[%s4210_s2] sm:$0xff] %v4362_v44  ;;  %v681_v45 = vpack.c.bf16 %v4362_v44, %v4362_v44  ;;  %v984_v38 = vmul.f32 0.1, %v4362_v44 }
 0x18a   : > { %907 = vmatmul.mubr.bf16.vlgmr.msra.gmra.mxu0 %v681_v45  ;;  %948 = vmatmul.mubr.bf16.vlgmr.msra.gmra.mxu1 %v681_v45 }
 0x18b   : > { %1191 = vmatpush1.bf16.msra.mxu0 %v4215_v3  ;;  %1232 = vmatpush1.bf16.msra.mxu1 %v4230_v9 }
 0x18c   : > { %1192 = vmatprep.subr.bf16.mxu0 %v4220_v5  ;;  %1233 = vmatprep.subr.bf16.mxu1 %v4240_v12 }
 0x18d   : > { %1222 = vmatprep.mubr.bf16.mxu0 %v4021_v4  ;;  %1263 = vmatprep.mubr.bf16.mxu1 %v4021_v4 }
 0x18f   : > { %1193 = vmatpush1.bf16.msra.mxu0 %v4223_v6  ;;  %1234 = vmatpush1.bf16.msra.mxu1 %v4242_v13 }
 0x190   : > { %1194 = vmatprep.subr.bf16.mxu0 %v4226_v7  ;;  %1235 = vmatprep.subr.bf16.mxu1 %v4250_v16 }
 0x193   : > { %1195 = vmatpush1.bf16.msra.mxu0 %v4233_v10  ;;  %1236 = vmatpush1.bf16.msra.mxu1 %v4254_v17 }
 0x194   : > { %1196 = vmatprep.subr.bf16.mxu0 %v4237_v11  ;;  %1237 = vmatprep.subr.bf16.mxu1 %v4257_v18 }
 0x197   : > { %1197 = vmatpush1.bf16.msra.mxu0 %v4246_v14  ;;  %1238 = vmatpush1.bf16.msra.mxu1 %v4266_v21 }
 0x198   : > { %1198 = vmatprep.subr.bf16.mxu0 %v4248_v15  ;;  %1239 = vmatprep.subr.bf16.mxu1 %v4269_v22 }
 0x19b   : > { %1199 = vmatpush1.bf16.msra.mxu0 %v4260_v19  ;;  %1240 = vmatpush1.bf16.msra.mxu1 %v4278_v25 }
 0x19c   : > { %1200 = vmatprep.subr.bf16.mxu0 %v4263_v20  ;;  %1241 = vmatprep.subr.bf16.mxu1 %v4283_v27 }
 0x19f   : > { %1201 = vmatpush1.bf16.msra.mxu0 %v4272_v23  ;;  %1242 = vmatpush1.bf16.msra.mxu1 %v4287_v29 }
 0x1a0   : > { %1202 = vmatprep.subr.bf16.mxu0 %v4274_v24  ;;  %1243 = vmatprep.subr.bf16.mxu1 %v4290_v30 }
 0x1a3   : > { %1203 = vmatpush1.bf16.msra.mxu0 %v4280_v26  ;;  %1244 = vmatpush1.bf16.msra.mxu1 %v4299_v33 }
 0x1a4   : > { %1204 = vmatprep.subr.bf16.mxu0 %v4285_v28  ;;  %1245 = vmatprep.subr.bf16.mxu1 %v4302_v34 }
 0x1a7   : > { %1205 = vmatpush1.bf16.msra.mxu0 %v4294_v31  ;;  %1246 = vmatpush1.bf16.msra.mxu1 %v4311_v36 }
 0x1a8   : > { %1506 = vmatprep.subr.bf16.mxu0 %v4213_v2  ;;  %1547 = vmatprep.subr.bf16.mxu1 %v4228_v8  ;;  %v3137_v2 = vld [vmem:[%s4195_s15 + $0x38] sm:$0xff] }
 0x24a   : > { %v908_v46 = vpop.f32.mrf.mxu0  ;;  %v949_v47 = vpop.f32.mrf.mxu1 }
 0x24b   : > { %v956_v49 = vadd.f32 %v3134_v32, %v908_v46  ;;  %v958_v62 = vadd.f32 %v3136_v59, %v949_v47 }
 0x24c   : > { %v910_v50 = vpop.f32.mrf.mxu0  ;;  %v951_v51 = vpop.f32.mrf.mxu1 }
 0x24d   : > { %v3170_v52 = vmul.f32 -1.442695, %v956_v49  ;;  %v957_v53 = vadd.f32 %v3135_v48, %v910_v50  ;;  %v959_v8 = vadd.f32 %v3137_v2, %v951_v51 }
 0x24e   : > { %v912_v54 = vpop.f32.mrf.mxu0  ;;  %v953_v55 = vpop.f32.mrf.mxu1 }
 0x24f   : > { %3653 = vpow2.f32 %v3170_v52  ;;  %v3171_v56 = vmul.f32 -1.442695, %v957_v53  ;;  %v3172_v60 = vmul.f32 -1.442695, %v959_v8 }
 0x250   : > { %v913_v57 = vpop.f32.mrf.mxu0  ;;  %v954_v58 = vpop.f32.mrf.mxu1 }
 0x251   : > { %3655 = vpow2.f32 %v3171_v56 }
 0x252   : > { %3657 = vpow2.f32 %v3172_v60 }
 0x25c   : > { %v3654_v61 = vpop.eup %3653 }
 0x25d   : > { %v963_v0 = vadd.f32 1.0, %v3654_v61 }
 0x25e   : > { %v3656_v1 = vpop.eup %3655 }
 0x25f   : > { %3659 = vrcp.f32 %v963_v0  ;;  %v969_v35 = vadd.f32 1.0, %v3656_v1  ;;  %v3658_v40 = vpop.eup %3657  ;;  %v4476_v0 = vld [vmem:[#allocation7 + $0xec] ss:$16 sps:$4 sm:$0xff]   ;;  %v4478_v1 = vld [vmem:[#allocation7 + $0xe0] ss:$16 sps:$4 sm:$0xff]  }
 0x260   : > { %3661 = vtanh.f32 %v958_v62  ;;  %v976_v32 = vadd.f32 1.0, %v3658_v40  ;;  %v4474_v62 = vld [vmem:[#allocation7 + $0xe4] ss:$16 sps:$4 sm:$0xff]   ;;  %v4490_v40 = vld [vmem:[#allocation7 + $0xc0] ss:$16 sps:$4 sm:$0xff]  }
 0x261   : > { %3663 = vrcp.f32 %v969_v35  ;;  %v4480_v35 = vld [vmem:[#allocation7 + $0xe8] ss:$16 sps:$4 sm:$0xff]  }
 0x262   : > { %3665 = vrcp.f32 %v976_v32  ;;  %v4504_v32 = vld [vmem:[#allocation7 + $0xa8] ss:$16 sps:$4 sm:$0xff]  }
 0x26c   : > { %v3660_v41 = vpop.eup %3659 }
 0x26d   : > { %v3662_v42 = vpop.eup %3661 }
 0x26e   : > { %v3664_v45 = vpop.eup %3663  ;;  %v980_v46 = vmul.f32 %v3662_v42, %v3660_v41  ;;  %v4492_v41 = vld [vmem:[#allocation7 + $0xc8] ss:$16 sps:$4 sm:$0xff]   ;;  %v4498_v42 = vld [vmem:[#allocation7 + $0xa4] ss:$16 sps:$4 sm:$0xff]  }
 0x26f   : > { %v979_v47 = vmul.f32 %v3664_v45, %v4408_v43  ;;  %v3666_v49 = vpop.eup %3665  ;;  %v4502_v45 = vld [vmem:[#allocation7 + $0xa0] ss:$16 sps:$4 sm:$0xff]  }
 0x271   : > { %v4411_v48 = vadd.f32 %v980_v46, %v979_v47  ;;  %v4510_v46 = vld [vmem:[#allocation7 + $0x80] ss:$16 sps:$4 sm:$0xff]   ;;  %v4512_v47 = vld [vmem:[#allocation7 + $0x84] ss:$16 sps:$4 sm:$0xff]  }
 0x273   : > { %3667 = vtanh.f32 %v4411_v48 }
 0x280   : > { %v3668_v63 = vpop.eup %3667 }
 0x281   : > { %v983_v50 = vmul.f32 %v3668_v63, %v3666_v49  ;;  %v4516_v49 = vld [vmem:[#allocation7 + $0x8c] ss:$16 sps:$4 sm:$0xff]   ;;  %v4518_v63 = vld [vmem:[#allocation7 + $0x64] ss:$16 sps:$4 sm:$0xff]  }
 0x283   : > { %v985_v51 = vmul.f32 0.9, %v983_v50  ;;  %v4521_v50 = vld [vmem:[#allocation7 + $0x6c] ss:$16 sps:$4 sm:$0xff]  }
 0x285   : > { %v4415_v52 = vadd.f32 %v985_v51, %v984_v38  ;;  %v4526_v38 = vld [vmem:[#allocation7 + $0x60] ss:$16 sps:$4 sm:$0xff]   ;;  %v4528_v51 = vld [vmem:[#allocation7 + $0x68] ss:$16 sps:$4 sm:$0xff]  }
 0x287   : > { %3173 = vst [vmem:[%s4210_s2 + $0x8] sm:$0xff] %v4415_v52  ;;  %v997_v53 = vpack.c.bf16 %v4415_v52, %v4415_v52  ;;  %v1300_v8 = vmul.f32 0.1, %v4415_v52  ;;  %v4532_v52 = vld [vmem:[#allocation7 + $0x44] ss:$16 sps:$4 sm:$0xff]  }
 0x289   : > { %1223 = vmatmul.mubr.bf16.vlgmr.msra.gmra.mxu0 %v997_v53  ;;  %1264 = vmatmul.mubr.bf16.vlgmr.msra.gmra.mxu1 %v997_v53  ;;  %v4534_v53 = vld [vmem:[#allocation7 + $0x4c] ss:$16 sps:$4 sm:$0xff]  }
 0x28a   : > { %1507 = vmatpush1.bf16.msra.mxu0 %v4215_v3  ;;  %1548 = vmatpush1.bf16.msra.mxu1 %v4230_v9  ;;  %v3174_v3 = vld [vmem:[%s4195_s15 + $0x40] sm:$0xff] }
 0x28b   : > { %1508 = vmatprep.subr.bf16.mxu0 %v4220_v5  ;;  %1549 = vmatprep.subr.bf16.mxu1 %v4240_v12 }
 0x28c   : > { %1538 = vmatprep.mubr.bf16.mxu0 %v4021_v4  ;;  %1579 = vmatprep.mubr.bf16.mxu1 %v4021_v4 }
 0x28e   : > { %1509 = vmatpush1.bf16.msra.mxu0 %v4223_v6  ;;  %1550 = vmatpush1.bf16.msra.mxu1 %v4242_v13 }
 0x28f   : > { %1510 = vmatprep.subr.bf16.mxu0 %v4226_v7  ;;  %1551 = vmatprep.subr.bf16.mxu1 %v4250_v16  ;;  %v3175_v7 = vld [vmem:[%s4195_s15 + $0x48] sm:$0xff] }
 0x292   : > { %1511 = vmatpush1.bf16.msra.mxu0 %v4233_v10  ;;  %1552 = vmatpush1.bf16.msra.mxu1 %v4254_v17 }
 0x293   : > { %1512 = vmatprep.subr.bf16.mxu0 %v4237_v11  ;;  %1553 = vmatprep.subr.bf16.mxu1 %v4257_v18 }
 0x296   : > { %1513 = vmatpush1.bf16.msra.mxu0 %v4246_v14  ;;  %1554 = vmatpush1.bf16.msra.mxu1 %v4266_v21  ;;  %v3176_v21 = vld [vmem:[%s4195_s15 + $0x50] sm:$0xff] }
 0x297   : > { %1514 = vmatprep.subr.bf16.mxu0 %v4248_v15  ;;  %1555 = vmatprep.subr.bf16.mxu1 %v4269_v22 }
 0x29a   : > { %1515 = vmatpush1.bf16.msra.mxu0 %v4260_v19  ;;  %1556 = vmatpush1.bf16.msra.mxu1 %v4278_v25  ;;  %v3177_v19 = vld [vmem:[%s4195_s15 + $0x58] sm:$0xff] }
 0x29b   : > { %1516 = vmatprep.subr.bf16.mxu0 %v4263_v20  ;;  %1557 = vmatprep.subr.bf16.mxu1 %v4283_v27 }
 0x29e   : > { %1517 = vmatpush1.bf16.msra.mxu0 %v4272_v23  ;;  %1558 = vmatpush1.bf16.msra.mxu1 %v4287_v29 }
 0x29f   : > { %1518 = vmatprep.subr.bf16.mxu0 %v4274_v24  ;;  %1559 = vmatprep.subr.bf16.mxu1 %v4290_v30  ;;  %v987_v30 = vmul.f32 0.1, %v4408_v43  ;;  %v4500_v43 = vld [vmem:[#allocation7 + $0xac] ss:$16 sps:$4 sm:$0xff]  }
 0x2a2   : > { %1519 = vmatpush1.bf16.msra.mxu0 %v4280_v26  ;;  %1560 = vmatpush1.bf16.msra.mxu1 %v4299_v33 }
 0x2a3   : > { %1520 = vmatprep.subr.bf16.mxu0 %v4285_v28  ;;  %1561 = vmatprep.subr.bf16.mxu1 %v4302_v34  ;;  %v988_v28 = vmul.f32 0.9, %v4411_v48  ;;  %v4514_v48 = vld [vmem:[#allocation7 + $0x88] ss:$16 sps:$4 sm:$0xff]  }
 0x2a5   : > { %v4459_v34 = vadd.f32 %v988_v28, %v987_v30 }
 0x2a6   : > { %1521 = vmatpush1.bf16.msra.mxu0 %v4294_v31  ;;  %1562 = vmatpush1.bf16.msra.mxu1 %v4311_v36 }
 0x2a7   : > { %1822 = vmatprep.subr.bf16.mxu0 %v4474_v62  ;;  %1863 = vmatprep.subr.bf16.mxu1 %v4476_v0 }
 0x349   : > { %v1224_v5 = vpop.f32.mrf.mxu0  ;;  %v1265_v6 = vpop.f32.mrf.mxu1 }
 0x34a   : > { %v1272_v9 = vadd.f32 %v3174_v3, %v1224_v5  ;;  %v1274_v24 = vadd.f32 %v3176_v21, %v1265_v6  ;;  %v4538_v3 = vld [vmem:[#allocation7 + $0x40] ss:$16 sps:$4 sm:$0xff]   ;;  %v4540_v5 = vld [vmem:[#allocation7 + $0x48] ss:$16 sps:$4 sm:$0xff]   ;;  %v4544_v6 = vld [vmem:[#allocation7 + $0x24] ss:$16 sps:$4 sm:$0xff]  }
 0x34b   : > { %v1226_v10 = vpop.f32.mrf.mxu0  ;;  %v1267_v11 = vpop.f32.mrf.mxu1 }
 0x34c   : > { %v3210_v12 = vmul.f32 -1.442695, %v1272_v9  ;;  %v1273_v13 = vadd.f32 %v3175_v7, %v1226_v10  ;;  %v1275_v20 = vadd.f32 %v3177_v19, %v1267_v11  ;;  %v4546_v7 = vld [vmem:[#allocation7 + $0x2c] ss:$16 sps:$4 sm:$0xff]   ;;  %v4550_v9 = vld [vmem:[#allocation7 + $0x20] ss:$16 sps:$4 sm:$0xff]  }
 0x34d   : > { %v1228_v14 = vpop.f32.mrf.mxu0  ;;  %v1269_v15 = vpop.f32.mrf.mxu1  ;;  %v4552_v10 = vld [vmem:[#allocation7 + $0x28] ss:$16 sps:$4 sm:$0xff]   ;;  %v4556_v11 = vld [vmem:[#allocation7 + $0x4] ss:$16 sps:$4 sm:$0xff]  }
 0x34e   : > { %3669 = vpow2.f32 %v3210_v12  ;;  %v3211_v16 = vmul.f32 -1.442695, %v1273_v13  ;;  %v3212_v22 = vmul.f32 -1.442695, %v1275_v20  ;;  %v4558_v12 = vld [vmem:[#allocation7 + $0xc] ss:$16 sps:$4 sm:$0xff]  }
 0x34f   : > { %v1229_v17 = vpop.f32.mrf.mxu0  ;;  %v1270_v18 = vpop.f32.mrf.mxu1  ;;  %v4562_v13 = vld [vmem:[#allocation7] ss:$16 sps:$4 sm:$0xff]   ;;  %v4564_v14 = vld [vmem:[#allocation7 + $0x8] ss:$16 sps:$4 sm:$0xff]  }
 0x350   : > { %3671 = vpow2.f32 %v3211_v16  ;;  %v3214_v15 = vld [vmem:[%s4195_s15 + $0x60] sm:$0xff]  ;;  %v3215_v18 = vld [vmem:[%s4195_s15 + $0x68] sm:$0xff] }
 0x351   : > { %3673 = vpow2.f32 %v3212_v22 }
 0x35b   : > { %v3670_v23 = vpop.eup %3669 }
 0x35c   : > { %v1279_v25 = vadd.f32 1.0, %v3670_v23 }
 0x35d   : > { %v3672_v26 = vpop.eup %3671 }
 0x35e   : > { %3675 = vrcp.f32 %v1279_v25  ;;  %v1285_v27 = vadd.f32 1.0, %v3672_v26  ;;  %v3674_v29 = vpop.eup %3673 }
 0x35f   : > { %3677 = vtanh.f32 %v1274_v24  ;;  %v1292_v44 = vadd.f32 1.0, %v3674_v29  ;;  %v3217_v29 = vld [vmem:[%s4195_s15 + $0x78] sm:$0xff] }
 0x360   : > { %3679 = vrcp.f32 %v1285_v27 }
 0x361   : > { %3681 = vrcp.f32 %v1292_v44 }
 0x36b   : > { %v3676_v31 = vpop.eup %3675 }
 0x36c   : > { %v3678_v33 = vpop.eup %3677 }
 0x36d   : > { %v3680_v36 = vpop.eup %3679  ;;  %v1296_v54 = vmul.f32 %v3678_v33, %v3676_v31  ;;  %v3216_v31 = vld [vmem:[%s4195_s15 + $0x70] sm:$0xff] }
 0x36e   : > { %v1295_v55 = vmul.f32 %v3680_v36, %v4459_v34  ;;  %v3682_v57 = vpop.eup %3681 }
 0x370   : > { %v4462_v56 = vadd.f32 %v1296_v54, %v1295_v55 }
 0x372   : > { %3683 = vtanh.f32 %v4462_v56 }
 0x37f   : > { %v3684_v58 = vpop.eup %3683 }
 0x380   : > { %v1299_v2 = vmul.f32 %v3684_v58, %v3682_v57  ;;  %v1304_v58 = vmul.f32 0.9, %v4462_v56 }
 0x382   : > { %v1301_v59 = vmul.f32 0.9, %v1299_v2 }
 0x384   : > { %v4466_v60 = vadd.f32 %v1301_v59, %v1300_v8  ;;  %v1303_v8 = vmul.f32 0.1, %v4459_v34 }
 0x386   : > { %3213 = vst [vmem:[%s4210_s2 + $0x10] sm:$0xff] %v4466_v60  ;;  %v1313_v61 = vpack.c.bf16 %v4466_v60, %v4466_v60  ;;  %v1616_v34 = vmul.f32 0.1, %v4466_v60  ;;  %v3254_v60 = vld [vmem:[%s4195_s15 + $0x80] sm:$0xff] }
 0x388   : > { %1539 = vmatmul.mubr.bf16.vlgmr.msra.gmra.mxu0 %v1313_v61  ;;  %1580 = vmatmul.mubr.bf16.vlgmr.msra.gmra.mxu1 %v1313_v61 }
 0x389   : > { %1854 = vmatprep.mubr.bf16.mxu0 %v4021_v4  ;;  %1895 = vmatprep.mubr.bf16.mxu1 %v4021_v4 }
 0x38a   : > { %1823 = vmatpush1.bf16.msra.mxu0 %v4478_v1  ;;  %1864 = vmatpush1.bf16.msra.mxu1 %v4480_v35 }
 0x38b   : > { %1824 = vmatprep.subr.bf16.mxu0 %v4486_v37  ;;  %1865 = vmatprep.subr.bf16.mxu1 %v4488_v39 }
 0x38e   : > { %1825 = vmatpush1.bf16.msra.mxu0 %v4490_v40  ;;  %1866 = vmatpush1.bf16.msra.mxu1 %v4492_v41 }
 0x38f   : > { %1826 = vmatprep.subr.bf16.mxu0 %v4498_v42  ;;  %1867 = vmatprep.subr.bf16.mxu1 %v4500_v43 }
 0x392   : > { %1827 = vmatpush1.bf16.msra.mxu0 %v4502_v45  ;;  %1868 = vmatpush1.bf16.msra.mxu1 %v4504_v32 }
 0x393   : > { %1828 = vmatprep.subr.bf16.mxu0 %v4512_v47  ;;  %1869 = vmatprep.subr.bf16.mxu1 %v4516_v49 }
 0x396   : > { %1829 = vmatpush1.bf16.msra.mxu0 %v4510_v46  ;;  %1870 = vmatpush1.bf16.msra.mxu1 %v4514_v48 }
 0x397   : > { %1830 = vmatprep.subr.bf16.mxu0 %v4518_v63  ;;  %1871 = vmatprep.subr.bf16.mxu1 %v4521_v50 }
 0x39a   : > { %1831 = vmatpush1.bf16.msra.mxu0 %v4526_v38  ;;  %1872 = vmatpush1.bf16.msra.mxu1 %v4528_v51 }
 0x39b   : > { %1832 = vmatprep.subr.bf16.mxu0 %v4532_v52  ;;  %1873 = vmatprep.subr.bf16.mxu1 %v4534_v53 }
 0x39e   : > { %1833 = vmatpush1.bf16.msra.mxu0 %v4538_v3  ;;  %1874 = vmatpush1.bf16.msra.mxu1 %v4540_v5 }
 0x39f   : > { %1834 = vmatprep.subr.bf16.mxu0 %v4544_v6  ;;  %1875 = vmatprep.subr.bf16.mxu1 %v4546_v7 }
 0x3a2   : > { %1835 = vmatpush1.bf16.msra.mxu0 %v4550_v9  ;;  %1876 = vmatpush1.bf16.msra.mxu1 %v4552_v10 }
 0x3a3   : > { %1836 = vmatprep.subr.bf16.mxu0 %v4556_v11  ;;  %1877 = vmatprep.subr.bf16.mxu1 %v4558_v12 }
 0x3a6   : > { %1837 = vmatpush1.bf16.msra.mxu0 %v4562_v13  ;;  %1878 = vmatpush1.bf16.msra.mxu1 %v4564_v14 }
 0x3a7   : > { %2138 = vmatprep.subr.bf16.mxu0 %v4474_v62  ;;  %2179 = vmatprep.subr.bf16.mxu1 %v4476_v0 }
 0x448   : > { %v1540_v16 = vpop.f32.mrf.mxu0  ;;  %v1581_v17 = vpop.f32.mrf.mxu1 }
 0x449   : > { %v1588_v19 = vadd.f32 %v3214_v15, %v1540_v16  ;;  %v1590_v44 = vadd.f32 %v3216_v31, %v1581_v17  ;;  %v4578_v15 = vadd.f32 %v1304_v58, %v1303_v8 }
 0x44a   : > { %v1542_v20 = vpop.f32.mrf.mxu0  ;;  %v1583_v21 = vpop.f32.mrf.mxu1 }
 0x44b   : > { %v3250_v22 = vmul.f32 -1.442695, %v1588_v19  ;;  %v1589_v23 = vadd.f32 %v3215_v18, %v1542_v20  ;;  %v1591_v30 = vadd.f32 %v3217_v29, %v1583_v21 }
 0x44c   : > { %v1544_v24 = vpop.f32.mrf.mxu0  ;;  %v1585_v25 = vpop.f32.mrf.mxu1 }
 0x44d   : > { %3685 = vpow2.f32 %v3250_v22  ;;  %v3251_v26 = vmul.f32 -1.442695, %v1589_v23  ;;  %v3252_v33 = vmul.f32 -1.442695, %v1591_v30 }
 0x44e   : > { %v1545_v27 = vpop.f32.mrf.mxu0  ;;  %v1586_v28 = vpop.f32.mrf.mxu1 }
 0x44f   : > { %3687 = vpow2.f32 %v3251_v26  ;;  %v3255_v28 = vld [vmem:[%s4195_s15 + $0x88] sm:$0xff] }
 0x450   : > { %3689 = vpow2.f32 %v3252_v33 }
 0x45a   : > { %v3686_v36 = vpop.eup %3685 }
 0x45b   : > { %v1595_v54 = vadd.f32 1.0, %v3686_v36 }
 0x45c   : > { %v3688_v55 = vpop.eup %3687 }
 0x45d   : > { %3691 = vrcp.f32 %v1595_v54  ;;  %v1601_v57 = vadd.f32 1.0, %v3688_v55  ;;  %v3690_v2 = vpop.eup %3689 }
 0x45e   : > { %3693 = vtanh.f32 %v1590_v44  ;;  %v1608_v18 = vadd.f32 1.0, %v3690_v2  ;;  %v3257_v2 = vld [vmem:[%s4195_s15 + $0x98] sm:$0xff] }
 0x45f   : > { %3695 = vrcp.f32 %v1601_v57 }
 0x460   : > { %3697 = vrcp.f32 %v1608_v18 }
 0x46a   : > { %v3692_v59 = vpop.eup %3691 }
 0x46b   : > { %v3694_v61 = vpop.eup %3693 }
 0x46c   : > { %v3696_v16 = vpop.eup %3695  ;;  %v1612_v17 = vmul.f32 %v3694_v61, %v3692_v59  ;;  %v3256_v59 = vld [vmem:[%s4195_s15 + $0x90] sm:$0xff] }
 0x46d   : > { %v1611_v19 = vmul.f32 %v3696_v16, %v4578_v15  ;;  %v3698_v21 = vpop.eup %3697 }
 0x46f   : > { %v4581_v20 = vadd.f32 %v1612_v17, %v1611_v19 }
 0x471   : > { %3699 = vtanh.f32 %v4581_v20 }
 0x47e   : > { %v3700_v56 = vpop.eup %3699 }
 0x47f   : > { %v1615_v22 = vmul.f32 %v3700_v56, %v3698_v21  ;;  %v1620_v56 = vmul.f32 0.9, %v4581_v20 }
 0x481   : > { %v1617_v23 = vmul.f32 0.9, %v1615_v22 }
 0x483   : > { %v4585_v24 = vadd.f32 %v1617_v23, %v1616_v34  ;;  %v1619_v34 = vmul.f32 0.1, %v4578_v15 }
 0x485   : > { %3253 = vst [vmem:[%s4210_s2 + $0x18] sm:$0xff] %v4585_v24  ;;  %v1629_v25 = vpack.c.bf16 %v4585_v24, %v4585_v24  ;;  %v1932_v15 = vmul.f32 0.1, %v4585_v24  ;;  %v3294_v24 = vld [vmem:[%s4195_s15 + $0xa0] sm:$0xff] }
 0x487   : > { %1855 = vmatmul.mubr.bf16.vlgmr.msra.gmra.mxu0 %v1629_v25  ;;  %1896 = vmatmul.mubr.bf16.vlgmr.msra.gmra.mxu1 %v1629_v25 }
 0x488   : > { %2139 = vmatpush1.bf16.msra.mxu0 %v4478_v1  ;;  %2180 = vmatpush1.bf16.msra.mxu1 %v4480_v35 }
 0x489   : > { %2140 = vmatprep.subr.bf16.mxu0 %v4486_v37  ;;  %2181 = vmatprep.subr.bf16.mxu1 %v4488_v39 }
 0x48a   : > { %2170 = vmatprep.mubr.bf16.mxu0 %v4021_v4  ;;  %2211 = vmatprep.mubr.bf16.mxu1 %v4021_v4 }
 0x48c   : > { %2141 = vmatpush1.bf16.msra.mxu0 %v4490_v40  ;;  %2182 = vmatpush1.bf16.msra.mxu1 %v4492_v41 }
 0x48d   : > { %2142 = vmatprep.subr.bf16.mxu0 %v4498_v42  ;;  %2183 = vmatprep.subr.bf16.mxu1 %v4500_v43 }
 0x490   : > { %2143 = vmatpush1.bf16.msra.mxu0 %v4502_v45  ;;  %2184 = vmatpush1.bf16.msra.mxu1 %v4504_v32 }
 0x491   : > { %2144 = vmatprep.subr.bf16.mxu0 %v4512_v47  ;;  %2185 = vmatprep.subr.bf16.mxu1 %v4516_v49 }
 0x494   : > { %2145 = vmatpush1.bf16.msra.mxu0 %v4510_v46  ;;  %2186 = vmatpush1.bf16.msra.mxu1 %v4514_v48 }
 0x495   : > { %2146 = vmatprep.subr.bf16.mxu0 %v4518_v63  ;;  %2187 = vmatprep.subr.bf16.mxu1 %v4521_v50 }
 0x498   : > { %2147 = vmatpush1.bf16.msra.mxu0 %v4526_v38  ;;  %2188 = vmatpush1.bf16.msra.mxu1 %v4528_v51 }
 0x499   : > { %2148 = vmatprep.subr.bf16.mxu0 %v4532_v52  ;;  %2189 = vmatprep.subr.bf16.mxu1 %v4534_v53 }
 0x49c   : > { %2149 = vmatpush1.bf16.msra.mxu0 %v4538_v3  ;;  %2190 = vmatpush1.bf16.msra.mxu1 %v4540_v5 }
 0x49d   : > { %2150 = vmatprep.subr.bf16.mxu0 %v4544_v6  ;;  %2191 = vmatprep.subr.bf16.mxu1 %v4546_v7 }
 0x4a0   : > { %2151 = vmatpush1.bf16.msra.mxu0 %v4550_v9  ;;  %2192 = vmatpush1.bf16.msra.mxu1 %v4552_v10 }
 0x4a1   : > { %2152 = vmatprep.subr.bf16.mxu0 %v4556_v11  ;;  %2193 = vmatprep.subr.bf16.mxu1 %v4558_v12 }
 0x4a4   : > { %2153 = vmatpush1.bf16.msra.mxu0 %v4562_v13  ;;  %2194 = vmatpush1.bf16.msra.mxu1 %v4564_v14 }
 0x4a5   : > { %2454 = vmatprep.subr.bf16.mxu0 %v4474_v62  ;;  %2495 = vmatprep.subr.bf16.mxu1 %v4476_v0 }
 0x547   : > { %v1856_v26 = vpop.f32.mrf.mxu0  ;;  %v1897_v27 = vpop.f32.mrf.mxu1 }
 0x548   : > { %v1904_v29 = vadd.f32 %v3254_v60, %v1856_v26  ;;  %v1906_v18 = vadd.f32 %v3256_v59, %v1897_v27  ;;  %v4631_v60 = vadd.f32 %v1620_v56, %v1619_v34 }
 0x549   : > { %v1858_v30 = vpop.f32.mrf.mxu0  ;;  %v1899_v31 = vpop.f32.mrf.mxu1 }
 0x54a   : > { %v3290_v33 = vmul.f32 -1.442695, %v1904_v29  ;;  %v1905_v36 = vadd.f32 %v3255_v28, %v1858_v30  ;;  %v1907_v8 = vadd.f32 %v3257_v2, %v1899_v31 }
 0x54b   : > { %v1860_v44 = vpop.f32.mrf.mxu0  ;;  %v1901_v54 = vpop.f32.mrf.mxu1 }
 0x54c   : > { %3701 = vpow2.f32 %v3290_v33  ;;  %v3291_v55 = vmul.f32 -1.442695, %v1905_v36  ;;  %v3292_v61 = vmul.f32 -1.442695, %v1907_v8 }
 0x54d   : > { %v1861_v57 = vpop.f32.mrf.mxu0  ;;  %v1902_v58 = vpop.f32.mrf.mxu1 }
 0x54e   : > { %3703 = vpow2.f32 %v3291_v55  ;;  %v3295_v58 = vld [vmem:[%s4195_s15 + $0xa8] sm:$0xff] }
 0x54f   : > { %3705 = vpow2.f32 %v3292_v61 }
 0x559   : > { %v3702_v16 = vpop.eup %3701 }
 0x55a   : > { %v1911_v17 = vadd.f32 1.0, %v3702_v16 }
 0x55b   : > { %v3704_v19 = vpop.eup %3703 }
 0x55c   : > { %3707 = vrcp.f32 %v1911_v17  ;;  %v1917_v21 = vadd.f32 1.0, %v3704_v19  ;;  %v3706_v22 = vpop.eup %3705 }
 0x55d   : > { %3709 = vtanh.f32 %v1906_v18  ;;  %v1924_v28 = vadd.f32 1.0, %v3706_v22  ;;  %v3296_v22 = vld [vmem:[%s4195_s15 + $0xb0] sm:$0xff] }
 0x55e   : > { %3711 = vrcp.f32 %v1917_v21 }
 0x55f   : > { %3713 = vrcp.f32 %v1924_v28 }
 0x569   : > { %v3708_v23 = vpop.eup %3707 }
 0x56a   : > { %v3710_v25 = vpop.eup %3709 }
 0x56b   : > { %v3712_v26 = vpop.eup %3711  ;;  %v1928_v27 = vmul.f32 %v3710_v25, %v3708_v23 }
 0x56c   : > { %v1927_v29 = vmul.f32 %v3712_v26, %v4631_v60  ;;  %v3714_v31 = vpop.eup %3713 }
 0x56e   : > { %v4634_v30 = vadd.f32 %v1928_v27, %v1927_v29 }
 0x570   : > { %3715 = vtanh.f32 %v4634_v30  ;;  %v1936_v29 = vmul.f32 0.9, %v4634_v30 }
 0x57d   : > { %v3716_v20 = vpop.eup %3715 }
 0x57e   : > { %v1931_v33 = vmul.f32 %v3716_v20, %v3714_v31  ;;  %v1935_v20 = vmul.f32 0.1, %v4631_v60 }
 0x580   : > { %v1933_v36 = vmul.f32 0.9, %v1931_v33 }
 0x582   : > { %v4638_v44 = vadd.f32 %v1933_v36, %v1932_v15  ;;  %v4684_v36 = vadd.f32 %v1936_v29, %v1935_v20 }
 0x584   : > { %3293 = vst [vmem:[%s4210_s2 + $0x20] sm:$0xff] %v4638_v44  ;;  %v1945_v54 = vpack.c.bf16 %v4638_v44, %v4638_v44  ;;  %v2248_v60 = vmul.f32 0.1, %v4638_v44 }
 0x586   : > { %2171 = vmatmul.mubr.bf16.vlgmr.msra.gmra.mxu0 %v1945_v54  ;;  %2212 = vmatmul.mubr.bf16.vlgmr.msra.gmra.mxu1 %v1945_v54 }
 0x587   : > { %2455 = vmatpush1.bf16.msra.mxu0 %v4478_v1  ;;  %2496 = vmatpush1.bf16.msra.mxu1 %v4480_v35 }
 0x588   : > { %2456 = vmatprep.subr.bf16.mxu0 %v4486_v37  ;;  %2497 = vmatprep.subr.bf16.mxu1 %v4488_v39 }
 0x589   : > { %2486 = vmatprep.mubr.bf16.mxu0 %v4021_v4  ;;  %2527 = vmatprep.mubr.bf16.mxu1 %v4021_v4 }
 0x58b   : > { %2457 = vmatpush1.bf16.msra.mxu0 %v4490_v40  ;;  %2498 = vmatpush1.bf16.msra.mxu1 %v4492_v41 }
 0x58c   : > { %2458 = vmatprep.subr.bf16.mxu0 %v4498_v42  ;;  %2499 = vmatprep.subr.bf16.mxu1 %v4500_v43 }
 0x58f   : > { %2459 = vmatpush1.bf16.msra.mxu0 %v4502_v45  ;;  %2500 = vmatpush1.bf16.msra.mxu1 %v4504_v32 }
 0x590   : > { %2460 = vmatprep.subr.bf16.mxu0 %v4512_v47  ;;  %2501 = vmatprep.subr.bf16.mxu1 %v4516_v49 }
 0x593   : > { %2461 = vmatpush1.bf16.msra.mxu0 %v4510_v46  ;;  %2502 = vmatpush1.bf16.msra.mxu1 %v4514_v48 }
 0x594   : > { %2462 = vmatprep.subr.bf16.mxu0 %v4518_v63  ;;  %2503 = vmatprep.subr.bf16.mxu1 %v4521_v50 }
 0x597   : > { %2463 = vmatpush1.bf16.msra.mxu0 %v4526_v38  ;;  %2504 = vmatpush1.bf16.msra.mxu1 %v4528_v51 }
 0x598   : > { %2464 = vmatprep.subr.bf16.mxu0 %v4532_v52  ;;  %2505 = vmatprep.subr.bf16.mxu1 %v4534_v53 }
 0x59b   : > { %2465 = vmatpush1.bf16.msra.mxu0 %v4538_v3  ;;  %2506 = vmatpush1.bf16.msra.mxu1 %v4540_v5 }
 0x59c   : > { %2466 = vmatprep.subr.bf16.mxu0 %v4544_v6  ;;  %2507 = vmatprep.subr.bf16.mxu1 %v4546_v7 }
 0x59f   : > { %2467 = vmatpush1.bf16.msra.mxu0 %v4550_v9  ;;  %2508 = vmatpush1.bf16.msra.mxu1 %v4552_v10 }
 0x5a0   : > { %2468 = vmatprep.subr.bf16.mxu0 %v4556_v11  ;;  %2509 = vmatprep.subr.bf16.mxu1 %v4558_v12 }
 0x5a3   : > { %2469 = vmatpush1.bf16.msra.mxu0 %v4562_v13  ;;  %2510 = vmatpush1.bf16.msra.mxu1 %v4564_v14 }
 0x5a4   : > { %2770 = vmatprep.subr.bf16.mxu0 %v4474_v62  ;;  %2811 = vmatprep.subr.bf16.mxu1 %v4476_v0  ;;  %v3297_v62 = vld [vmem:[%s4195_s15 + $0xb8] sm:$0xff] }
 0x646   : > { %v2172_v55 = vpop.f32.mrf.mxu0  ;;  %v2213_v57 = vpop.f32.mrf.mxu1 }
 0x647   : > { %v2220_v2 = vadd.f32 %v3294_v24, %v2172_v55  ;;  %v2222_v25 = vadd.f32 %v3296_v22, %v2213_v57 }
 0x648   : > { %v2174_v8 = vpop.f32.mrf.mxu0  ;;  %v2215_v59 = vpop.f32.mrf.mxu1 }
 0x649   : > { %v3330_v61 = vmul.f32 -1.442695, %v2220_v2  ;;  %v2221_v16 = vadd.f32 %v3295_v58, %v2174_v8  ;;  %v2223_v0 = vadd.f32 %v3297_v62, %v2215_v59 }
 0x64a   : > { %v2176_v18 = vpop.f32.mrf.mxu0  ;;  %v2217_v17 = vpop.f32.mrf.mxu1 }
 0x64b   : > { %3717 = vpow2.f32 %v3330_v61  ;;  %v3331_v19 = vmul.f32 -1.442695, %v2221_v16  ;;  %v3332_v34 = vmul.f32 -1.442695, %v2223_v0 }
 0x64c   : > { %v2177_v21 = vpop.f32.mrf.mxu0  ;;  %v2218_v56 = vpop.f32.mrf.mxu1 }
 0x64d   : > { %3719 = vpow2.f32 %v3331_v19 }
 0x64e   : > { %3721 = vpow2.f32 %v3332_v34 }
 0x658   : > { %v3718_v23 = vpop.eup %3717 }
 0x659   : > { %v2227_v26 = vadd.f32 1.0, %v3718_v23  ;;  %v3374_v23 = vld [vmem:[%s4195_s15 + $0xe0] sm:$0xff] }
 0x65a   : > { %v3720_v28 = vpop.eup %3719 }
 0x65b   : > { %3723 = vrcp.f32 %v2227_v26  ;;  %v2233_v27 = vadd.f32 1.0, %v3720_v28  ;;  %v3722_v31 = vpop.eup %3721  ;;  %v3375_v28 = vld [vmem:[%s4195_s15 + $0xe8] sm:$0xff] }
 0x65c   : > { %3725 = vtanh.f32 %v2222_v25  ;;  %v2240_v24 = vadd.f32 1.0, %v3722_v31 }
 0x65d   : > { %3727 = vrcp.f32 %v2233_v27 }
 0x65e   : > { %3729 = vrcp.f32 %v2240_v24 }
 0x668   : > { %v3724_v33 = vpop.eup %3723 }
 0x669   : > { %v3726_v15 = vpop.eup %3725 }
 0x66a   : > { %v3728_v54 = vpop.eup %3727  ;;  %v2244_v55 = vmul.f32 %v3726_v15, %v3724_v33 }
 0x66b   : > { %v2243_v57 = vmul.f32 %v3728_v54, %v4684_v36  ;;  %v3730_v2 = vpop.eup %3729 }
 0x66d   : > { %v4687_v58 = vadd.f32 %v2244_v55, %v2243_v57  ;;  %v3377_v57 = vld [vmem:[%s4195_s15 + $0xf8] sm:$0xff] }
 0x66f   : > { %3731 = vtanh.f32 %v4687_v58 }
 0x67c   : > { %v3732_v30 = vpop.eup %3731 }
 0x67d   : > { %v2247_v8 = vmul.f32 %v3732_v30, %v3730_v2  ;;  %v3376_v2 = vld [vmem:[%s4195_s15 + $0xf0] sm:$0xff] }
 0x67f   : > { %v2249_v59 = vmul.f32 0.9, %v2247_v8 }
 0x681   : > { %v4691_v61 = vadd.f32 %v2249_v59, %v2248_v60 }
 0x683   : > { %3333 = vst [vmem:[%s4210_s2 + $0x28] sm:$0xff] %v4691_v61  ;;  %v2261_v16 = vpack.c.bf16 %v4691_v61, %v4691_v61  ;;  %v2564_v62 = vmul.f32 0.1, %v4691_v61 }
 0x685   : > { %2487 = vmatmul.mubr.bf16.vlgmr.msra.gmra.mxu0 %v2261_v16  ;;  %2528 = vmatmul.mubr.bf16.vlgmr.msra.gmra.mxu1 %v2261_v16 }
 0x686   : > { %2771 = vmatpush1.bf16.msra.mxu0 %v4478_v1  ;;  %2812 = vmatpush1.bf16.msra.mxu1 %v4480_v35 }
 0x687   : > { %2772 = vmatprep.subr.bf16.mxu0 %v4486_v37  ;;  %2813 = vmatprep.subr.bf16.mxu1 %v4488_v39  ;;  %v3335_v37 = vld [vmem:[%s4195_s15 + $0xc8] sm:$0xff] }
 0x688   : > { %2802 = vmatprep.mubr.bf16.mxu0 %v4021_v4  ;;  %2843 = vmatprep.mubr.bf16.mxu1 %v4021_v4  ;;  %v3334_v4 = vld [vmem:[%s4195_s15 + $0xc0] sm:$0xff] }
 0x68a   : > { %2773 = vmatpush1.bf16.msra.mxu0 %v4490_v40  ;;  %2814 = vmatpush1.bf16.msra.mxu1 %v4492_v41 }
 0x68b   : > { %2774 = vmatprep.subr.bf16.mxu0 %v4498_v42  ;;  %2815 = vmatprep.subr.bf16.mxu1 %v4500_v43 }
 0x68e   : > { %2775 = vmatpush1.bf16.msra.mxu0 %v4502_v45  ;;  %2816 = vmatpush1.bf16.msra.mxu1 %v4504_v32 }
 0x68f   : > { %2776 = vmatprep.subr.bf16.mxu0 %v4512_v47  ;;  %2817 = vmatprep.subr.bf16.mxu1 %v4516_v49  ;;  %v3337_v49 = vld [vmem:[%s4195_s15 + $0xd8] sm:$0xff] }
 0x692   : > { %2777 = vmatpush1.bf16.msra.mxu0 %v4510_v46  ;;  %2818 = vmatpush1.bf16.msra.mxu1 %v4514_v48 }
 0x693   : > { %2778 = vmatprep.subr.bf16.mxu0 %v4518_v63  ;;  %2819 = vmatprep.subr.bf16.mxu1 %v4521_v50  ;;  %v3336_v50 = vld [vmem:[%s4195_s15 + $0xd0] sm:$0xff] }
 0x696   : > { %2779 = vmatpush1.bf16.msra.mxu0 %v4526_v38  ;;  %2820 = vmatpush1.bf16.msra.mxu1 %v4528_v51 }
 0x697   : > { %2780 = vmatprep.subr.bf16.mxu0 %v4532_v52  ;;  %2821 = vmatprep.subr.bf16.mxu1 %v4534_v53 }
 0x69a   : > { %2781 = vmatpush1.bf16.msra.mxu0 %v4538_v3  ;;  %2822 = vmatpush1.bf16.msra.mxu1 %v4540_v5 }
 0x69b   : > { %2782 = vmatprep.subr.bf16.mxu0 %v4544_v6  ;;  %2823 = vmatprep.subr.bf16.mxu1 %v4546_v7  ;;  %v2252_v6 = vmul.f32 0.9, %v4687_v58 }
 0x69e   : > { %2783 = vmatpush1.bf16.msra.mxu0 %v4550_v9  ;;  %2824 = vmatpush1.bf16.msra.mxu1 %v4552_v10  ;;  %v2251_v9 = vmul.f32 0.1, %v4684_v36 }
 0x69f   : > { %2784 = vmatprep.subr.bf16.mxu0 %v4556_v11  ;;  %2825 = vmatprep.subr.bf16.mxu1 %v4558_v12 }
 0x6a0   : > { %v2253_v12 = vadd.f32 %v2252_v6, %v2251_v9 }
 0x6a2   : > { %2785 = vmatpush1.bf16.msra.mxu0 %v4562_v13  ;;  %2826 = vmatpush1.bf16.msra.mxu1 %v4564_v14 }
 0x745   : > { %v2488_v1 = vpop.f32.mrf.mxu0  ;;  %v2529_v35 = vpop.f32.mrf.mxu1 }
 0x746   : > { %v2536_v39 = vadd.f32 %v3334_v4, %v2488_v1  ;;  %v2538_v52 = vadd.f32 %v3336_v50, %v2529_v35  ;;  %v2567_v35 = vmul.f32 0.1, %v2253_v12 }
 0x747   : > { %v2490_v40 = vpop.f32.mrf.mxu0  ;;  %v2531_v41 = vpop.f32.mrf.mxu1 }
 0x748   : > { %v3370_v42 = vmul.f32 -1.442695, %v2536_v39  ;;  %v2537_v43 = vadd.f32 %v3335_v37, %v2490_v40  ;;  %v2539_v63 = vadd.f32 %v3337_v49, %v2531_v41 }
 0x749   : > { %v2492_v45 = vpop.f32.mrf.mxu0  ;;  %v2533_v32 = vpop.f32.mrf.mxu1 }
 0x74a   : > { %3733 = vpow2.f32 %v3370_v42  ;;  %v3371_v46 = vmul.f32 -1.442695, %v2537_v43  ;;  %v3372_v38 = vmul.f32 -1.442695, %v2539_v63 }
 0x74b   : > { %v2493_v47 = vpop.f32.mrf.mxu0  ;;  %v2534_v48 = vpop.f32.mrf.mxu1 }
 0x74c   : > { %3735 = vpow2.f32 %v3371_v46 }
 0x74d   : > { %3737 = vpow2.f32 %v3372_v38 }
 0x757   : > { %v3734_v51 = vpop.eup %3733 }
 0x758   : > { %v2543_v53 = vadd.f32 1.0, %v3734_v51 }
 0x759   : > { %v3736_v3 = vpop.eup %3735 }
 0x75a   : > { %3739 = vrcp.f32 %v2543_v53  ;;  %v2549_v5 = vadd.f32 1.0, %v3736_v3  ;;  %v3738_v7 = vpop.eup %3737 }
 0x75b   : > { %3741 = vtanh.f32 %v2538_v52  ;;  %v2556_v14 = vadd.f32 1.0, %v3738_v7 }
 0x75c   : > { %3743 = vrcp.f32 %v2549_v5 }
 0x75d   : > { %3745 = vrcp.f32 %v2556_v14 }
 0x767   : > { %v3740_v10 = vpop.eup %3739 }
 0x768   : > { %v3742_v11 = vpop.eup %3741 }
 0x769   : > { %v3744_v13 = vpop.eup %3743  ;;  %v2560_v44 = vmul.f32 %v3742_v11, %v3740_v10 }
 0x76a   : > { %v2559_v18 = vmul.f32 %v3744_v13, %v2253_v12  ;;  %v3746_v19 = vpop.eup %3745 }
 0x76c   : > { %v2561_v17 = vadd.f32 %v2560_v44, %v2559_v18 }
 0x76e   : > { %3747 = vtanh.f32 %v2561_v17  ;;  %v2568_v4 = vmul.f32 0.9, %v2561_v17 }
 0x770   : > { %v2569_v40 = vadd.f32 %v2568_v4, %v2567_v35 }
 0x772   : > { %v2883_v46 = vmul.f32 0.1, %v2569_v40 }
 0x77b   : > { %v3748_v21 = vpop.eup %3747 }
 0x77c   : > { %v2563_v56 = vmul.f32 %v3748_v21, %v3746_v19 }
 0x77e   : > { %v2565_v0 = vmul.f32 0.9, %v2563_v56 }
 0x780   : > { %v2566_v22 = vadd.f32 %v2565_v0, %v2564_v62 }
 0x782   : > { %3373 = vst [vmem:[%s4210_s2 + $0x30] sm:$0xff] %v2566_v22  ;;  %v2577_v34 = vpack.c.bf16 %v2566_v22, %v2566_v22  ;;  %v2880_v38 = vmul.f32 0.1, %v2566_v22 }
 0x784   : > { %2803 = vmatmul.mubr.bf16.vlgmr.msra.gmra.mxu0 %v2577_v34  ;;  %2844 = vmatmul.mubr.bf16.vlgmr.msra.gmra.mxu1 %v2577_v34 }
 0x844   : > { %v2804_v25 = vpop.f32.mrf.mxu0  ;;  %v2845_v26 = vpop.f32.mrf.mxu1 }
 0x845   : > { %v2852_v27 = vadd.f32 %v3374_v23, %v2804_v25  ;;  %v2854_v60 = vadd.f32 %v3376_v2, %v2845_v26 }
 0x846   : > { %v2806_v29 = vpop.f32.mrf.mxu0  ;;  %v2847_v31 = vpop.f32.mrf.mxu1 }
 0x847   : > { %v3410_v20 = vmul.f32 -1.442695, %v2852_v27  ;;  %v2853_v33 = vadd.f32 %v3375_v28, %v2806_v29  ;;  %v2855_v58 = vadd.f32 %v3377_v57, %v2847_v31 }
 0x848   : > { %v2808_v15 = vpop.f32.mrf.mxu0  ;;  %v2849_v36 = vpop.f32.mrf.mxu1 }
 0x849   : > { %3749 = vpow2.f32 %v3410_v20  ;;  %v3411_v54 = vmul.f32 -1.442695, %v2853_v33  ;;  %v3412_v30 = vmul.f32 -1.442695, %v2855_v58 }
 0x84a   : > { %v2809_v24 = vpop.f32.mrf.mxu0  ;;  %v2850_v55 = vpop.f32.mrf.mxu1 }
 0x84b   : > { %3751 = vpow2.f32 %v3411_v54 }
 0x84c   : > { %3753 = vpow2.f32 %v3412_v30 }
 0x856   : > { %v3750_v8 = vpop.eup %3749 }
 0x857   : > { %v2859_v59 = vadd.f32 1.0, %v3750_v8 }
 0x858   : > { %v3752_v61 = vpop.eup %3751 }
 0x859   : > { %3755 = vrcp.f32 %v2859_v59  ;;  %v2865_v16 = vadd.f32 1.0, %v3752_v61  ;;  %v3754_v1 = vpop.eup %3753 }
 0x85a   : > { %3757 = vtanh.f32 %v2854_v60  ;;  %v2872_v42 = vadd.f32 1.0, %v3754_v1 }
 0x85b   : > { %3759 = vrcp.f32 %v2865_v16 }
 0x85c   : > { %3761 = vrcp.f32 %v2872_v42 }
 0x866   : > { %v3756_v37 = vpop.eup %3755 }
 0x867   : > { %v3758_v39 = vpop.eup %3757 }
 0x868   : > { %v3760_v41 = vpop.eup %3759  ;;  %v2876_v43 = vmul.f32 %v3758_v39, %v3756_v37 }
 0x869   : > { %v2875_v45 = vmul.f32 %v3760_v41, %v2569_v40  ;;  %v3762_v49 = vpop.eup %3761 }
 0x86b   : > { %v2877_v32 = vadd.f32 %v2876_v43, %v2875_v45 }
 0x86d   : > { %3763 = vtanh.f32 %v2877_v32  ;;  %v2884_v47 = vmul.f32 0.9, %v2877_v32 }
 0x86f   : > { %v2885_v48 = vadd.f32 %v2884_v47, %v2883_v46 }
 0x871   : > { %2889 = vst [vmem:[#allocation3] sm:$0xff] %v2885_v48 }
 0x87a   : > { %v3764_v63 = vpop.eup %3763 }
 0x87b   : > { %v2879_v50 = vmul.f32 %v3764_v63, %v3762_v49 }
 0x87d   : > { %v2881_v51 = vmul.f32 0.9, %v2879_v50  ;;  %2893 = sbr.rel (%p3414_p7) target bundleno = 2179 (0x883), region = 60 }
 0x87f   : > { %v2882_v52 = vadd.f32 %v2881_v51, %v2880_v38 }
 0x881   : > { %3413 = vst [vmem:[%s4210_s2 + $0x38] sm:$0xff] %v2882_v52  ;;  %2888 = vst [vmem:[#allocation2] sm:$0xff] %v2882_v52 }
 0x882   : > { %2894 = vst [vmem:[#allocation13] sm:$0xff] %v2882_v52  ;;  %2895 = vst [vmem:[#allocation15] sm:$0xff] %v2885_v48 }
 0x883 PF: > { %s4022_s29 = smov [#allocation13]   ;;  %s3426_s9 = sshll.u32 %s4003_s24, 10 }
 0x884   : > { %s2927_s7 = sshll.u32 %s4022_s29, 4  ;;  %s2928_s7 = int_to_ptr.vmem [resolvable:$true] %s2927_s7 }
 0x885   : > { %s3871_s11 = scalar_lea.vmem %s2928_s7, 128  ;;  %p3878_p1 = scmp.lt.s32.totalorder %s2928_s7, %s2928_s7 }
 0x886   : > { %p3872_p6 = scmp.ne.s32.totalorder %s2928_s7, %s3871_s11  ;;  %p3879_p4 = scmp.lt.s32.totalorder %s3871_s11, %s3871_s11 }
 0x888   : > { %p3873_p9 = pnand %p3872_p6, %p4100_p2  ;;  %p3880_p8 = por %p3879_p4, %p3878_p1 }
 0x88a   : > { %p3874_p12 = pneg %p3873_p9 }
 0x88c   : > { %p3881_p11 = pnand %p3880_p8, %p3874_p12 }
 0x88e   : > { %3884 = shalt.err (!%p3881_p11)
}
 0x88f   : > { %3443 = dma.vmem_to_hbm [thread:$0]  (%p4100_p2), %s2928_s7, 128, %s4820_s5, [#allocation14]  }
 0x890   : > { %s4754_s27 = scalar_lea.hbm %s4819_s4, %s3426_s9  ;;  %s2911_s16 = sshll.u32 %s4210_s2, 4  ;;  %s4757_s16 = int_to_ptr.vmem [resolvable:$true] %s2911_s16 }
 0x891   : > { %s2897_s10 = scalar_lea.sflag [#allocation6], %s4191_s19  ;;  %s3895_s13 = scalar_lea.vmem %s4757_s16, 1024 }
 0x892   : > { %p3896_p3 = scmp.ne.s32.totalorder %s4757_s16, %s3895_s13  ;;  %s4023_s3 = smov [#allocation12]  }
 0x893   : > { %s3899_s15 = sshll.u32 %s4023_s3, 4  ;;  %s3900_s15 = int_to_ptr.vmem [resolvable:$false] %s3899_s15 }
 0x894   : > { %p3897_p0 = pnand %p3896_p3, %p4161_p13  ;;  %s3901_s1 = scalar_lea.vmem %s3900_s15, 2048 }
 0x895   : > { %p3902_p10 = scmp.lt.s32.totalorder %s4757_s16, %s3900_s15  ;;  %p3903_p7 = scmp.lt.s32.totalorder %s3901_s1, %s3895_s13 }
 0x896   : > { %p3898_p5 = pneg %p3897_p0 }
 0x897   : > { %p3904_p6 = por %p3903_p7, %p3902_p10 }
 0x899   : > { %p3905_p9 = pnand %p3904_p6, %p3898_p5 }
 0x89b   : > { %3908 = shalt.err (!%p3905_p9)
}
 0x89c   : > { %s3909_s2 = scalar_lea.hbm %s4754_s27, 1024  ;;  %s3913_s9 = scalar_lea.hbm %s4819_s4, 4096 }
 0x89d   : > { %p3910_p12 = scmp.ne.s32.totalorder %s4754_s27, %s3909_s2  ;;  %p3914_p8 = scmp.lt.s32.totalorder %s4754_s27, %s4819_s4 }
 0x89e   : > { %p3915_p11 = scmp.lt.s32.totalorder %s3913_s9, %s3909_s2 }
 0x89f   : > { %p3911_p1 = pnand %p3910_p12, %p4161_p13 }
 0x8a0   : > { %p3916_p3 = por %p3915_p11, %p3914_p8 }
 0x8a1   : > { %p3912_p4 = pneg %p3911_p1 }
 0x8a3   : > { %p3917_p0 = pnand %p3916_p3, %p3912_p4 }
 0x8a5   : > { %3920 = shalt.err (!%p3917_p0)
}
 0x8a6   : > { %s4024_s20 = smov 128   ;;  %s4025_s24 = smov 8  }
 0x8a7   : > { %3441 = dma.vmem_to_hbm [thread:$0]  (%p4161_p13), %s4757_s16, 1024, %s4754_s27, %s2897_s10, %s4024_s20, %s4024_s20, %s4025_s24  }
 0x8a8   : > { %s4026_s14 = smov [#allocation15]  }
 0x8a9   : > { %s2940_s13 = sshll.u32 %s4026_s14, 4  ;;  %s2941_s13 = int_to_ptr.vmem [resolvable:$true] %s2940_s13 }
 0x8aa   : > { %s3921_s3 = scalar_lea.vmem %s2941_s13, 128  ;;  %p3928_p6 = scmp.lt.s32.totalorder %s2941_s13, %s2941_s13 }
 0x8ab   : > { %p3922_p5 = scmp.ne.s32.totalorder %s2941_s13, %s3921_s3  ;;  %p3929_p9 = scmp.lt.s32.totalorder %s3921_s3, %s3921_s3 }
 0x8ad   : > { %p3923_p10 = pnand %p3922_p5, %p4100_p2  ;;  %p3930_p12 = por %p3929_p9, %p3928_p6 }
 0x8af   : > { %p3924_p7 = pneg %p3923_p10 }
 0x8b1   : > { %p3931_p1 = pnand %p3930_p12, %p3924_p7 }
 0x8b3   : > { %3934 = shalt.err (!%p3931_p1)
}
 0x8b4   : > { %3445 = dma.vmem_to_hbm [thread:$0]  (%p4100_p2), %s2941_s13, 128, %s4821_s6, [#allocation14]  }
 0x8b5   : > { %3982 = dma.done.wait (%p4100_p2), [#allocation14], 256  }
 0x8b6   : > { %3984 = vsyncadd (%p4100_p2), [#allocation14], 4294967040 }
 0x8b7 PF: > { %p3480_p13 = scmp.ge.s32.totalorder %s4011_s26, 2  ;;  %s2960_s12 = sand.u32 1, %s3991_s21  }
 0x8b8   : > { %p4843_p4 = scmp.ne.s32.totalorder %s4832_s8, 0  ;;  %s2961_s19 = scalar_lea.sflag [#allocation6], %s2960_s12 }
 0x8ba   : > { %p3466_p8 = pnand %p3480_p13, %p4843_p4 }
 0x8bc   : > { %p3467_p11 = pneg %p3466_p8 }
 0x8be   : > { %3986 = dma.done.wait (%p3467_p11), %s2961_s19, 1024  }
 0x8bf   : > { %3988 = vsyncadd (%p3467_p11), %s2961_s19, 4294966272  ;;  %s26_s26 = sadd.s32 1, %s4011_s26   ;;  %s4844_s21 = smov %s3995_s22 }
 0x8c0   : > { %p23_p3 = scmp.ge.s32.totalorder %s26_s26, 6   ;;  %s4845_s22 = smov %s3999_s23 }
 0x8c1   : > { %s4846_s23 = smov %s4173_s28  ;;  %s4847_s24 = smov %s4007_s25 }
 0x8c2   : > { %s4848_s25 = smov %s4850_s18  ;;  %25 = sbr.rel (!%p23_p3) target bundleno = 13 (0xd), region = 135 }
 0x8c7   :  { %2966 = vsyncpa [#allocation5], 1 }
 0x8c8   :  { %2968 = vsyncpa [#allocation5 + $0x1], 1 }
 0x8c9   :  { %2969 = vsyncpa [#allocation8], 1 }
 0x8ca   :  { %2970 = vsyncpa [#allocation11], 1 }
 0x8cb   :  { %2971 = vsyncpa [#allocation6], 1 }
 0x8cc   :  { %2973 = vsyncpa [#allocation6 + $0x1], 1 }
 0x8cd   :  { %2974 = vsyncpa [#allocation14], 1 }

</bundles_post_ra>
